<compile_context>
chip_gen: v7x
topology: tpu7x:2x2x1
jax: 0.10.0
libtpu: 0.0.40
codegen_flags: <defaults>
</compile_context>

<pallas_src>
import functools

import jax
import jax.numpy as jnp
from jax import lax
from jax.experimental import pallas as pl
from jax.experimental.pallas import tpu as pltpu


def _round_up(x, m):
    return (x + m - 1) // m * m


def _vmem_capacity_bytes():
    try:
        return int(pltpu.get_tpu_info().vmem_capacity_bytes)
    except Exception:
        return 64 << 20          # conservative: v7x per-TensorCore VMEM


def _scoped_vmem_cap():
    # leave headroom for Mosaic internal scratch / semaphores / padding:
    # ~48 MiB on v7x (64 MiB physical), ~96 MiB on v5e/v6e (128 MiB).
    return (_vmem_capacity_bytes() * 3) // 4


def _stage2_plan(H, V):
    """Vocab-tile plan (must be identical in prepare_params and the wrapper):
    returns (TN, n_split, n_half, Vpad)."""
    stream_budget = _scoped_vmem_cap() // 2     # half the budget for the w_out stream
    B_EST = 16                                  # small decode batch assumption
    per_lane = 2 * (2 * H + 4 + 4 * B_EST)      # double-buffered bf16 W + f32 bias/logits
    tn_max = max(128, (stream_budget // per_lane) // 128 * 128)
    TN = min(4096, tn_max, _round_up(V, 128))
    if V >= 4 * 128:
        # keep >= ~4 tiles so each v7x core gets >= 2 pipelined steps
        TN = min(TN, _round_up(pl.cdiv(V, 4), 128))
    TN = max(TN, 128)
    n_tiles = pl.cdiv(V, TN)
    n_split = 2 if n_tiles >= 2 else 1          # leading "parallel" axis (v7x 2 TCs)
    n_half = pl.cdiv(n_tiles, n_split)
    Vpad = n_split * n_half * TN
    return TN, n_split, n_half, Vpad


# --------------------------------------------------------------------------
# Fused kernel: GRU cell + dot attention + concat-linear + vocab projection
# --------------------------------------------------------------------------
def fused_decoder_kernel(x_ref, h_ref, enc_ref,
                         w_ih_ref, w_hh_ref, b_ih_ref, b_hh_ref,
                         w_c_ref, b_c_ref,
                         w_o_ref, b_o_ref,
                         logits_ref, hid_ref, attn_ref,
                         concat_sc,
                         *, seq_len, hidden_size, gate_stride, use_mxu_attn):
    H = hidden_size
    G = gate_stride                 # 128-aligned per-gate lane stride (>= H)

    # ---- stage 1: run once per core (first vocab tile of this core) ----
    @pl.when(pl.program_id(1) == 0)
    def _stage1():
        x = x_ref[...]              # (B, E)
        h = h_ref[...]              # (B, H)
        enc = enc_ref[...]          # (B, Lp, H)  (L zero-padded to 128)

        # GRU cell, PyTorch gate order (r, z, n).  Gates are stacked into a
        # single (in, 3*G) weight so this is 2 MXU pushes instead of 6; gate
        # slices start at 128-aligned lane offsets.
        gi = jnp.dot(x, w_ih_ref[...],
                     preferred_element_type=jnp.float32) + b_ih_ref[...]
        gh = jnp.dot(h, w_hh_ref[...],
                     preferred_element_type=jnp.float32) + b_hh_ref[...]
        r = jax.nn.sigmoid(gi[:, 0:H] + gh[:, 0:H])
        z = jax.nn.sigmoid(gi[:, G:G + H] + gh[:, G:G + H])
        n = jnp.tanh(gi[:, 2 * G:2 * G + H] + r * gh[:, 2 * G:2 * G + H])
        h_new = (1.0 - z) * n + z * h                              # (B, H)

        # Luong 'dot' attention.  For decode-sized B the 1-row batched
        # dot_general wastes the MXU; do broadcast-multiply + reduce on the
        # VPU/XLU instead (MXU path kept for large B).
        if use_mxu_attn:
            scores = jnp.einsum("bh,blh->bl", h_new, enc,
                                preferred_element_type=jnp.float32)
        else:
            scores = jnp.sum(h_new[:, None, :] * enc, axis=-1)     # (B, Lp)
        l_pad = scores.shape[-1]
        if seq_len != l_pad:
            lane = lax.broadcasted_iota(jnp.int32, scores.shape, 1)
            scores = jnp.where(lane < seq_len, scores, -1e30)

        m = jnp.max(scores, axis=-1, keepdims=True)
        e = jnp.exp(scores - m)
        denom = jnp.sum(e, axis=-1, keepdims=True)
        # exact reciprocal so the 1e-5 attention check stays tight.
        attn = e * pl.reciprocal(denom, approx=False)               # (B, Lp)

        if use_mxu_attn:
            context = jnp.einsum("bl,blh->bh", attn, enc,
                                 preferred_element_type=jnp.float32)
        else:
            context = jnp.sum(attn[:, :, None] * enc, axis=1)       # (B, H)

        # tanh(Linear([h_new, context])) as two summed lane-aligned matmuls.
        concat_out = jnp.tanh(
            jnp.dot(h_new, w_c_ref[0], preferred_element_type=jnp.float32)
            + jnp.dot(context, w_c_ref[1], preferred_element_type=jnp.float32)
            + b_c_ref[...])                                          # (B, H)

        concat_sc[...] = concat_out.astype(concat_sc.dtype)         # bf16 scratch
        hid_ref[...] = h_new[None].astype(hid_ref.dtype)
        attn_ref[...] = attn[None].astype(attn_ref.dtype)

    # ---- stage 2: one bf16 vocab tile per grid step (both MXU operands bf16,
    #      f32 accumulation) ----
    logits_ref[...] = (
        jnp.dot(concat_sc[...], w_o_ref[...],
                preferred_element_type=jnp.float32)
        + b_o_ref[...]).astype(logits_ref.dtype)


# --------------------------------------------------------------------------
# Wrapper
# --------------------------------------------------------------------------
def prepare_params(params):
    """One-time weight re-layout (outside jit): transpose to (in, out), stack
    the GRU gates into a single lane-aligned weight, split the concat linear
    into its two (H, H) halves, and store the output projection in bf16,
    padded to the vocab-tile plan."""
    H = params["w_hh"].shape[1]
    E = params["w_ih"].shape[1]
    V = params["w_out"].shape[0]
    Hg = _round_up(H, 128)                       # 128-aligned per-gate stride

    w_ih_g = jnp.transpose(params["w_ih"].reshape(3, H, E), (0, 2, 1))   # (3, E, H)
    w_hh_g = jnp.transpose(params["w_hh"].reshape(3, H, H), (0, 2, 1))   # (3, H, H)

    def pack_gate_w(w, in_dim):
        out = jnp.zeros((in_dim, 3 * Hg), jnp.float32)
        for g in range(3):
            out = out.at[:, g * Hg:g * Hg + H].set(w[g])
        return out

    def pack_gate_b(b):
        out = jnp.zeros((1, 3 * Hg), jnp.float32)
        b3 = b.reshape(3, H)
        for g in range(3):
            out = out.at[:, g * Hg:g * Hg + H].set(b3[g][None])
        return out

    w_ih_all = pack_gate_w(w_ih_g, E)            # (E, 3*Hg)
    w_hh_all = pack_gate_w(w_hh_g, H)            # (H, 3*Hg)
    b_ih_all = pack_gate_b(params["b_ih"])       # (1, 3*Hg)
    b_hh_all = pack_gate_b(params["b_hh"])       # (1, 3*Hg)

    # concat input order is [rnn_output, context]
    w_c = jnp.stack([params["w_concat"][:, :H].T,
                     params["w_concat"][:, H:].T], axis=0)               # (2, H, H)

    # output projection: bf16, pre-transposed, padded to the tile plan
    TN, n_split, n_half, Vpad = _stage2_plan(H, V)
    w_out = params["w_out"].T.astype(jnp.bfloat16)                       # (H, V)
    b_out = params["b_out"].astype(jnp.float32)                          # (1, V)
    if Vpad != V:
        w_out = jnp.pad(w_out, ((0, 0), (0, Vpad - V)))
        b_out = jnp.pad(b_out, ((0, 0), (0, Vpad - V)))

    return {
        "embedding": params["embedding"],
        "w_ih": w_ih_all, "w_hh": w_hh_all, "b_ih": b_ih_all, "b_hh": b_hh_all,
        "w_c": w_c, "b_c": params["b_concat"],                           # (1, H)
        "w_out": w_out,                                                  # (H, Vpad) bf16
        "b_out": b_out,                                                  # (1, Vpad)
    }


@jax.jit
def luong_decoder_forward(input_ids, last_hidden, encoder_outputs, prep):
    # glue: embedding lookup (gather) stays in plain JAX
    embedded = prep["embedding"][input_ids[:, 0]]      # (B, E)
    B, E = embedded.shape
    H = last_hidden.shape[-1]
    L = encoder_outputs.shape[1]
    V = prep["embedding"].shape[0]                     # vocab size = embedding rows
    Hg = prep["w_ih"].shape[1] // 3
    h0 = last_hidden[0]                                # (B, H)

    # pad the key/attention axis to a lane-dense multiple of 128
    Lp = _round_up(L, 128)
    enc = encoder_outputs
    if Lp != L:
        enc = jnp.pad(enc, ((0, 0), (0, Lp - L), (0, 0)))

    # vocab-tile plan (same deterministic plan as prepare_params)
    TN, n_split, n_half, Vpad = _stage2_plan(H, V)
    assert prep["w_out"].shape == (H, Vpad), "prepare_params / plan mismatch"

    # generation-aware scoped-VMEM limit
    resident = 4 * (B * E + B * H + B * Lp * H + E * 3 * Hg + H * 3 * Hg
                    + 2 * 3 * Hg + 2 * H * H + H + B * H + B * Lp) + 2 * B * H
    stream = 2 * (2 * H * TN + 4 * TN + 4 * B * TN)
    vmem_limit = int(min(_scoped_vmem_cap(),
                         max(16 << 20, 2 * (resident + stream) + (4 << 20))))

    kernel = functools.partial(fused_decoder_kernel,
                               seq_len=L, hidden_size=H, gate_stride=Hg,
                               use_mxu_attn=(B >= 16))

    grid = (n_split, n_half)
    in_specs = [
        pl.BlockSpec((B, E), lambda c, j: (0, 0)),            # embedded
        pl.BlockSpec((B, H), lambda c, j: (0, 0)),            # h0
        pl.BlockSpec((B, Lp, H), lambda c, j: (0, 0, 0)),     # enc
        pl.BlockSpec((E, 3 * Hg), lambda c, j: (0, 0)),       # w_ih (stacked gates)
        pl.BlockSpec((H, 3 * Hg), lambda c, j: (0, 0)),       # w_hh
        pl.BlockSpec((1, 3 * Hg), lambda c, j: (0, 0)),       # b_ih
        pl.BlockSpec((1, 3 * Hg), lambda c, j: (0, 0)),       # b_hh
        pl.BlockSpec((2, H, H), lambda c, j: (0, 0, 0)),      # w_c
        pl.BlockSpec((1, H), lambda c, j: (0, 0)),            # b_c
        pl.BlockSpec((H, TN), lambda c, j: (0, c * n_half + j)),   # w_out (bf16 stream)
        pl.BlockSpec((1, TN), lambda c, j: (0, c * n_half + j)),   # b_out
    ]
    out_specs = (
        pl.BlockSpec((B, TN), lambda c, j: (0, c * n_half + j)),   # logits (lane-dense)
        pl.BlockSpec((1, B, H), lambda c, j: (c, 0, 0)),           # hidden (per core)
        pl.BlockSpec((1, B, Lp), lambda c, j: (c, 0, 0)),          # attn   (per core)
    )
    out_shape = (
        jax.ShapeDtypeStruct((B, Vpad), jnp.float32),
        jax.ShapeDtypeStruct((n_split, B, H), jnp.float32),
        jax.ShapeDtypeStruct((n_split, B, Lp), jnp.float32),
    )

    logits_pad, hid_out, attn_out = pl.pallas_call(
        kernel,
        out_shape=out_shape,
        grid=grid,
        in_specs=in_specs,
        out_specs=out_specs,
        scratch_shapes=[pltpu.VMEM((B, H), jnp.bfloat16)],    # concat_out scratch
        compiler_params=pltpu.CompilerParams(
            dimension_semantics=("parallel", "arbitrary"),
            vmem_limit_bytes=vmem_limit),
    )(embedded, h0, enc,
      prep["w_ih"], prep["w_hh"], prep["b_ih"], prep["b_hh"],
      prep["w_c"], prep["b_c"],
      prep["w_out"], prep["b_out"])

    logits = logits_pad[:, :V]                   # drop padded vocab columns
    hidden = hid_out[:1]                         # (1, B, H)   (core-0 copy)
    attn_weights = attn_out[0, :, :L][:, None]   # (B, 1, L)
    return logits, hidden, attn_weights


# --------------------------------------------------------------------------
# Pure-JAX reference + init
# --------------------------------------------------------------------------
def reference_forward(input_ids, last_hidden, encoder_outputs, params,
                      out_matmul_bf16=False):
    """Pure-JAX reference (same math, original PyTorch weight layout).
    out_matmul_bf16=True mirrors the deployed kernel's bf16 w_out stream
    (bf16-rounded operands, f32 accumulation) for the logits check."""
    H = last_hidden.shape[-1]
    x = params["embedding"][input_ids[:, 0]]
    h = last_hidden[0]
    gi = x @ params["w_ih"].T + params["b_ih"]
    gh = h @ params["w_hh"].T + params["b_hh"]
    r = jax.nn.sigmoid(gi[:, :H] + gh[:, :H])
    z = jax.nn.sigmoid(gi[:, H:2 * H] + gh[:, H:2 * H])
    n = jnp.tanh(gi[:, 2 * H:] + r * gh[:, 2 * H:])
    h_new = (1 - z) * n + z * h
    scores = jnp.einsum("bh,blh->bl", h_new, encoder_outputs)
    attn = jax.nn.softmax(scores, axis=-1)
    context = jnp.einsum("bl,blh->bh", attn, encoder_outputs)
    concat_out = jnp.tanh(jnp.concatenate([h_new, context], -1) @ params["w_concat"].T
                          + params["b_concat"])
    if out_matmul_bf16:
        c_o = concat_out.astype(jnp.bfloat16).astype(jnp.float32)
        w_o = params["w_out"].astype(jnp.bfloat16).astype(jnp.float32)
    else:
        c_o, w_o = concat_out, params["w_out"]
    logits = c_o @ w_o.T + params["b_out"]
    return logits, h_new[None], attn[:, None]


def init_params(key, V, E, H):
    ks = jax.random.split(key, 8)

    def xavier(k, shape):  # matches nn.init.xavier_uniform_
        fan_out, fan_in = shape
        lim = (6.0 / (fan_in + fan_out)) ** 0.5
        return jax.random.uniform(k, shape, jnp.float32, -lim, lim)

    s = 1.0 / (H ** 0.5)  # PyTorch GRU default init range
    return {
        "embedding": jax.random.normal(ks[0], (V, E), jnp.float32) * 0.1,
        "w_ih": jax.random.uniform(ks[1], (3 * H, E), jnp.float32, -s, s),
        "w_hh": jax.random.uniform(ks[2], (3 * H, H), jnp.float32, -s, s),
        "b_ih": jax.random.uniform(ks[3], (1, 3 * H), jnp.float32, -s, s),
        "b_hh": jax.random.uniform(ks[4], (1, 3 * H), jnp.float32, -s, s),
        "w_concat": xavier(ks[5], (H, 2 * H)),
        "b_concat": jnp.zeros((1, H), jnp.float32),
        "w_out": xavier(ks[6], (V, H)),
        "b_out": jnp.zeros((1, V), jnp.float32),
    }


if __name__ == "__main__":
    B, L, E, H, V = 2, 8, 32, 32, 128

    key = jax.random.PRNGKey(0)
    kp, k1, k2, k3 = jax.random.split(key, 4)
    params = init_params(kp, V, E, H)
    prep = prepare_params(params)   # one-time weight re-layout (outside jit)

    input_seq = jax.random.randint(k1, (B, 1), 0, V, dtype=jnp.int32)
    last_hidden = jax.random.normal(k2, (1, B, H), jnp.float32)
    encoder_outputs = jax.random.normal(k3, (B, L, H), jnp.float32)

    logits, hidden, attn_weights = luong_decoder_forward(
        input_seq, last_hidden, encoder_outputs, prep)
    jax.block_until_ready((logits, hidden, attn_weights))

    # tight check: reference with the same bf16-rounded output projection
    ref_logits_q, ref_hidden, ref_attn = reference_forward(
        input_seq, last_hidden, encoder_outputs, params, out_matmul_bf16=True)
    # loose sanity check vs the pure-f32 reference (bf16 weight quantization)
    ref_logits_f32, _, _ = reference_forward(
        input_seq, last_hidden, encoder_outputs, params, out_matmul_bf16=False)

    assert logits.shape == (B, V) and hidden.shape == (1, B, H) and attn_weights.shape == (B, 1, L)
    assert jnp.allclose(logits, ref_logits_q, atol=1e-4, rtol=1e-4)
    assert jnp.allclose(logits, ref_logits_f32, atol=5e-2, rtol=5e-2)
    assert jnp.allclose(hidden, ref_hidden, atol=1e-4, rtol=1e-4)
    assert jnp.allclose(attn_weights, ref_attn, atol=1e-5, rtol=1e-4)

    print("KERNEL_OK")
</pallas_src>

<mosaic_0001>
module attributes {stable_mosaic.version = 11 : i64} {
  func.func @fused_decoder_kernel(%arg0: i32, %arg1: i32, %arg2: memref<2x32xf32, #tpu.memory_space<vmem>>, %arg3: memref<2x32xf32, #tpu.memory_space<vmem>>, %arg4: memref<2x128x32xf32, #tpu.memory_space<vmem>>, %arg5: memref<32x384xf32, #tpu.memory_space<vmem>>, %arg6: memref<32x384xf32, #tpu.memory_space<vmem>>, %arg7: memref<1x384xf32, #tpu.memory_space<vmem>>, %arg8: memref<1x384xf32, #tpu.memory_space<vmem>>, %arg9: memref<2x32x32xf32, #tpu.memory_space<vmem>>, %arg10: memref<1x32xf32, #tpu.memory_space<vmem>>, %arg11: memref<32x128xbf16, #tpu.memory_space<vmem>>, %arg12: memref<1x128xf32, #tpu.memory_space<vmem>>, %arg13: memref<2x128xf32, #tpu.memory_space<vmem>>, %arg14: memref<1x2x32xf32, #tpu.memory_space<vmem>>, %arg15: memref<1x2x128xf32, #tpu.memory_space<vmem>>, %arg16: memref<2x32xbf16, #tpu.memory_space<vmem>>) attributes {dimension_semantics = [#tpu.dimension_semantics<parallel>, #tpu.dimension_semantics<arbitrary>], iteration_bounds = array<i64: 1, 1>, scalar_prefetch = 0 : i64, scratch_operands = 1 : i64, tpu.core_type = #tpu.core_type<tc>, window_params = [{pipeline_mode = #tpu.pipeline_mode<synchronous>, transform_indices = @transform_0, window_bounds = array<i64: 2, 32>}, {pipeline_mode = #tpu.pipeline_mode<synchronous>, transform_indices = @transform_1, window_bounds = array<i64: 2, 32>}, {pipeline_mode = #tpu.pipeline_mode<synchronous>, transform_indices = @transform_2, window_bounds = array<i64: 2, 128, 32>}, {pipeline_mode = #tpu.pipeline_mode<synchronous>, transform_indices = @transform_3, window_bounds = array<i64: 32, 384>}, {pipeline_mode = #tpu.pipeline_mode<synchronous>, transform_indices = @transform_4, window_bounds = array<i64: 32, 384>}, {pipeline_mode = #tpu.pipeline_mode<synchronous>, transform_indices = @transform_5, window_bounds = array<i64: 1, 384>}, {pipeline_mode = #tpu.pipeline_mode<synchronous>, transform_indices = @transform_6, window_bounds = array<i64: 1, 384>}, {pipeline_mode = #tpu.pipeline_mode<synchronous>, transform_indices = @transform_7, window_bounds = array<i64: 2, 32, 32>}, {pipeline_mode = #tpu.pipeline_mode<synchronous>, transform_indices = @transform_8, window_bounds = array<i64: 1, 32>}, {transform_indices = @transform_9, window_bounds = array<i64: 32, 128>}, {transform_indices = @transform_10, window_bounds = array<i64: 1, 128>}, {transform_indices = @transform_11, window_bounds = array<i64: 2, 128>}, {transform_indices = @transform_12, window_bounds = array<i64: 1, 2, 32>}, {transform_indices = @transform_13, window_bounds = array<i64: 1, 2, 128>}]} {
    %c0_i32 = arith.constant 0 : i32
    %0 = arith.cmpi eq, %arg1, %c0_i32 : i32
    %1 = arith.extui %0 : i1 to i32
    %c0_i32_0 = arith.constant 0 : i32
    %2 = arith.cmpi ne, %1, %c0_i32_0 : i32
    scf.if %2 {
      %c0_8 = arith.constant 0 : index
      %c0_9 = arith.constant 0 : index
      %10 = vector.load %arg2[%c0_8, %c0_9] : memref<2x32xf32, #tpu.memory_space<vmem>>, vector<2x32xf32>
      %c0_10 = arith.constant 0 : index
      %c0_11 = arith.constant 0 : index
      %11 = vector.load %arg3[%c0_10, %c0_11] : memref<2x32xf32, #tpu.memory_space<vmem>>, vector<2x32xf32>
      %c0_12 = arith.constant 0 : index
      %c0_13 = arith.constant 0 : index
      %c0_14 = arith.constant 0 : index
      %12 = vector.load %arg4[%c0_12, %c0_13, %c0_14] : memref<2x128x32xf32, #tpu.memory_space<vmem>>, vector<2x128x32xf32>
      %c0_15 = arith.constant 0 : index
      %c0_16 = arith.constant 0 : index
      %13 = vector.load %arg5[%c0_15, %c0_16] : memref<32x384xf32, #tpu.memory_space<vmem>>, vector<32x384xf32>
      %cst_17 = arith.constant dense<0.000000e+00> : vector<2x384xf32>
      %14 = tpu.matmul %10, %13, %cst_17 {dimension_numbers = #tpu.dot_dimension_numbers<[1], [0], [0], [1], [0, 0, 1, 1], [], []>} : vector<2x32xf32>, vector<32x384xf32>, vector<2x384xf32> -> vector<2x384xf32>
      %c0_18 = arith.constant 0 : index
      %c0_19 = arith.constant 0 : index
      %15 = vector.load %arg7[%c0_18, %c0_19] : memref<1x384xf32, #tpu.memory_space<vmem>>, vector<1x384xf32>
      %16 = vector.broadcast %15 : vector<1x384xf32> to vector<2x384xf32>
      %17 = arith.addf %14, %16 : vector<2x384xf32>
      %c0_20 = arith.constant 0 : index
      %c0_21 = arith.constant 0 : index
      %18 = vector.load %arg6[%c0_20, %c0_21] : memref<32x384xf32, #tpu.memory_space<vmem>>, vector<32x384xf32>
      %cst_22 = arith.constant dense<0.000000e+00> : vector<2x384xf32>
      %19 = tpu.matmul %11, %18, %cst_22 {dimension_numbers = #tpu.dot_dimension_numbers<[1], [0], [0], [1], [0, 0, 1, 1], [], []>} : vector<2x32xf32>, vector<32x384xf32>, vector<2x384xf32> -> vector<2x384xf32>
      %c0_23 = arith.constant 0 : index
      %c0_24 = arith.constant 0 : index
      %20 = vector.load %arg8[%c0_23, %c0_24] : memref<1x384xf32, #tpu.memory_space<vmem>>, vector<1x384xf32>
      %21 = vector.broadcast %20 : vector<1x384xf32> to vector<2x384xf32>
      %22 = arith.addf %19, %21 : vector<2x384xf32>
      %23 = vector.extract_strided_slice %17 {offsets = [0, 0], sizes = [2, 32], strides = [1, 1]} : vector<2x384xf32> to vector<2x32xf32>
      %24 = vector.extract_strided_slice %22 {offsets = [0, 0], sizes = [2, 32], strides = [1, 1]} : vector<2x384xf32> to vector<2x32xf32>
      %25 = arith.addf %23, %24 : vector<2x32xf32>
      %26 = arith.negf %25 : vector<2x32xf32>
      %27 = math.exp %26 : vector<2x32xf32>
      %cst_25 = arith.constant 1.000000e+00 : f32
      %28 = vector.broadcast %cst_25 : f32 to vector<2x32xf32>
      %29 = arith.addf %28, %27 : vector<2x32xf32>
      %30 = arith.divf %28, %29 : vector<2x32xf32>
      %31 = vector.extract_strided_slice %17 {offsets = [0, 128], sizes = [2, 32], strides = [1, 1]} : vector<2x384xf32> to vector<2x32xf32>
      %32 = vector.extract_strided_slice %22 {offsets = [0, 128], sizes = [2, 32], strides = [1, 1]} : vector<2x384xf32> to vector<2x32xf32>
      %33 = arith.addf %31, %32 : vector<2x32xf32>
      %34 = arith.negf %33 : vector<2x32xf32>
      %35 = math.exp %34 : vector<2x32xf32>
      %cst_26 = arith.constant 1.000000e+00 : f32
      %36 = vector.broadcast %cst_26 : f32 to vector<2x32xf32>
      %37 = arith.addf %36, %35 : vector<2x32xf32>
      %38 = arith.divf %36, %37 : vector<2x32xf32>
      %39 = vector.extract_strided_slice %17 {offsets = [0, 256], sizes = [2, 32], strides = [1, 1]} : vector<2x384xf32> to vector<2x32xf32>
      %40 = vector.extract_strided_slice %22 {offsets = [0, 256], sizes = [2, 32], strides = [1, 1]} : vector<2x384xf32> to vector<2x32xf32>
      %41 = arith.mulf %30, %40 : vector<2x32xf32>
      %42 = arith.addf %39, %41 : vector<2x32xf32>
      %43 = math.tanh %42 : vector<2x32xf32>
      %cst_27 = arith.constant 1.000000e+00 : f32
      %44 = vector.broadcast %cst_27 : f32 to vector<2x32xf32>
      %45 = arith.subf %44, %38 : vector<2x32xf32>
      %46 = arith.mulf %45, %43 : vector<2x32xf32>
      %47 = arith.mulf %38, %11 : vector<2x32xf32>
      %48 = arith.addf %46, %47 : vector<2x32xf32>
      %49 = vector.shape_cast %48 : vector<2x32xf32> to vector<2x1x32xf32>
      %50 = vector.broadcast %49 : vector<2x1x32xf32> to vector<2x128x32xf32>
      %51 = arith.mulf %50, %12 : vector<2x128x32xf32>
      %cst_28 = arith.constant dense<0.000000e+00> : vector<2x128xf32>
      %52 = vector.multi_reduction <add>, %51, %cst_28 [2] : vector<2x128x32xf32> to vector<2x128xf32>
      %53 = tpu.iota {dimensions = array<i32: 1>} : vector<2x128xi32>
      %c8_i32 = arith.constant 8 : i32
      %54 = vector.broadcast %c8_i32 : i32 to vector<2x128xi32>
      %55 = arith.cmpi slt, %53, %54 : vector<2x128xi32>
      %cst_29 = arith.constant -1.000000e+30 : f32
      %56 = vector.broadcast %cst_29 : f32 to vector<2x128xf32>
      %57 = arith.select %55, %52, %56 : vector<2x128xi1>, vector<2x128xf32>
      %cst_30 = arith.constant dense<0xFF800000> : vector<2xf32>
      %58 = vector.multi_reduction <maximumf>, %57, %cst_30 [1] : vector<2x128xf32> to vector<2xf32>
      %59 = vector.shape_cast %58 : vector<2xf32> to vector<2x1xf32>
      %60 = vector.broadcast %59 : vector<2x1xf32> to vector<2x128xf32>
      %61 = arith.subf %57, %60 : vector<2x128xf32>
      %62 = math.exp %61 : vector<2x128xf32>
      %cst_31 = arith.constant dense<0.000000e+00> : vector<2xf32>
      %63 = vector.multi_reduction <add>, %62, %cst_31 [1] : vector<2x128xf32> to vector<2xf32>
      %64 = vector.shape_cast %63 : vector<2xf32> to vector<2x1xf32>
      %65 = tpu.reciprocal %64 : vector<2x1xf32> -> vector<2x1xf32>
      %66 = vector.broadcast %65 : vector<2x1xf32> to vector<2x128xf32>
      %67 = arith.mulf %62, %66 : vector<2x128xf32>
      %68 = vector.shape_cast %67 : vector<2x128xf32> to vector<2x128x1xf32>
      %69 = vector.broadcast %68 : vector<2x128x1xf32> to vector<2x128x32xf32>
      %70 = arith.mulf %69, %12 : vector<2x128x32xf32>
      %cst_32 = arith.constant dense<0.000000e+00> : vector<2x32xf32>
      %71 = vector.multi_reduction <add>, %70, %cst_32 [1] : vector<2x128x32xf32> to vector<2x32xf32>
      %c0_33 = arith.constant 0 : index
      %c0_34 = arith.constant 0 : index
      %c0_35 = arith.constant 0 : index
      %72 = vector.load %arg9[%c0_33, %c0_34, %c0_35] : memref<2x32x32xf32, #tpu.memory_space<vmem>>, vector<1x32x32xf32>
      %73 = vector.shape_cast %72 : vector<1x32x32xf32> to vector<32x32xf32>
      %cst_36 = arith.constant dense<0.000000e+00> : vector<2x32xf32>
      %74 = tpu.matmul %48, %73, %cst_36 {dimension_numbers = #tpu.dot_dimension_numbers<[1], [0], [0], [1], [0, 0, 1, 1], [], []>} : vector<2x32xf32>, vector<32x32xf32>, vector<2x32xf32> -> vector<2x32xf32>
      %c1 = arith.constant 1 : index
      %c0_37 = arith.constant 0 : index
      %c0_38 = arith.constant 0 : index
      %75 = vector.load %arg9[%c1, %c0_37, %c0_38] : memref<2x32x32xf32, #tpu.memory_space<vmem>>, vector<1x32x32xf32>
      %76 = vector.shape_cast %75 : vector<1x32x32xf32> to vector<32x32xf32>
      %cst_39 = arith.constant dense<0.000000e+00> : vector<2x32xf32>
      %77 = tpu.matmul %71, %76, %cst_39 {dimension_numbers = #tpu.dot_dimension_numbers<[1], [0], [0], [1], [0, 0, 1, 1], [], []>} : vector<2x32xf32>, vector<32x32xf32>, vector<2x32xf32> -> vector<2x32xf32>
      %78 = arith.addf %74, %77 : vector<2x32xf32>
      %c0_40 = arith.constant 0 : index
      %c0_41 = arith.constant 0 : index
      %79 = vector.load %arg10[%c0_40, %c0_41] : memref<1x32xf32, #tpu.memory_space<vmem>>, vector<1x32xf32>
      %80 = vector.broadcast %79 : vector<1x32xf32> to vector<2x32xf32>
      %81 = arith.addf %78, %80 : vector<2x32xf32>
      %82 = math.tanh %81 : vector<2x32xf32>
      %83 = arith.truncf %82 : vector<2x32xf32> to vector<2x32xbf16>
      %c0_42 = arith.constant 0 : index
      %c0_43 = arith.constant 0 : index
      %84 = vector.load %arg16[%c0_42, %c0_43] : memref<2x32xbf16, #tpu.memory_space<vmem>>, vector<2x32xbf16>
      tpu.vector_store %arg16[%c0_42, %c0_43], %83 {strides = array<i32>} : memref<2x32xbf16, #tpu.memory_space<vmem>>, vector<2x32xbf16>,
      %85 = vector.shape_cast %48 : vector<2x32xf32> to vector<1x2x32xf32>
      %c0_44 = arith.constant 0 : index
      %c0_45 = arith.constant 0 : index
      %c0_46 = arith.constant 0 : index
      %86 = vector.load %arg14[%c0_44, %c0_45, %c0_46] : memref<1x2x32xf32, #tpu.memory_space<vmem>>, vector<1x2x32xf32>
      tpu.vector_store %arg14[%c0_44, %c0_45, %c0_46], %85 {strides = array<i32>} : memref<1x2x32xf32, #tpu.memory_space<vmem>>, vector<1x2x32xf32>,
      %87 = vector.shape_cast %67 : vector<2x128xf32> to vector<1x2x128xf32>
      %c0_47 = arith.constant 0 : index
      %c0_48 = arith.constant 0 : index
      %c0_49 = arith.constant 0 : index
      %88 = vector.load %arg15[%c0_47, %c0_48, %c0_49] : memref<1x2x128xf32, #tpu.memory_space<vmem>>, vector<1x2x128xf32>
      tpu.vector_store %arg15[%c0_47, %c0_48, %c0_49], %87 {strides = array<i32>} : memref<1x2x128xf32, #tpu.memory_space<vmem>>, vector<1x2x128xf32>,
    } else {
    }
    %c0 = arith.constant 0 : index
    %c0_1 = arith.constant 0 : index
    %3 = vector.load %arg16[%c0, %c0_1] : memref<2x32xbf16, #tpu.memory_space<vmem>>, vector<2x32xbf16>
    %c0_2 = arith.constant 0 : index
    %c0_3 = arith.constant 0 : index
    %4 = vector.load %arg11[%c0_2, %c0_3] : memref<32x128xbf16, #tpu.memory_space<vmem>>, vector<32x128xbf16>
    %cst = arith.constant dense<0.000000e+00> : vector<2x128xf32>
    %5 = tpu.matmul %3, %4, %cst {dimension_numbers = #tpu.dot_dimension_numbers<[1], [0], [0], [1], [0, 0, 1, 1], [], []>} : vector<2x32xbf16>, vector<32x128xbf16>, vector<2x128xf32> -> vector<2x128xf32>
    %c0_4 = arith.constant 0 : index
    %c0_5 = arith.constant 0 : index
    %6 = vector.load %arg12[%c0_4, %c0_5] : memref<1x128xf32, #tpu.memory_space<vmem>>, vector<1x128xf32>
    %7 = vector.broadcast %6 : vector<1x128xf32> to vector<2x128xf32>
    %8 = arith.addf %5, %7 : vector<2x128xf32>
    %c0_6 = arith.constant 0 : index
    %c0_7 = arith.constant 0 : index
    %9 = vector.load %arg13[%c0_6, %c0_7] : memref<2x128xf32, #tpu.memory_space<vmem>>, vector<2x128xf32>
    tpu.vector_store %arg13[%c0_6, %c0_7], %8 {strides = array<i32>} : memref<2x128xf32, #tpu.memory_space<vmem>>, vector<2x128xf32>,
    return
  }
  func.func @transform_0(%arg0: i32, %arg1: i32) -> (i32, i32) {
    %c0_i32 = arith.constant 0 : i32
    %c0_i32_0 = arith.constant 0 : i32
    %c0_i32_1 = arith.constant 0 : i32
    return %c0_i32, %c0_i32_0 : i32, i32
  }
  func.func @transform_1(%arg0: i32, %arg1: i32) -> (i32, i32) {
    %c0_i32 = arith.constant 0 : i32
    %c0_i32_0 = arith.constant 0 : i32
    %c0_i32_1 = arith.constant 0 : i32
    return %c0_i32, %c0_i32_0 : i32, i32
  }
  func.func @transform_2(%arg0: i32, %arg1: i32) -> (i32, i32, i32) {
    %c0_i32 = arith.constant 0 : i32
    %c0_i32_0 = arith.constant 0 : i32
    %c0_i32_1 = arith.constant 0 : i32
    %c0_i32_2 = arith.constant 0 : i32
    return %c0_i32, %c0_i32_0, %c0_i32_1 : i32, i32, i32
  }
  func.func @transform_3(%arg0: i32, %arg1: i32) -> (i32, i32) {
    %c0_i32 = arith.constant 0 : i32
    %c0_i32_0 = arith.constant 0 : i32
    %c0_i32_1 = arith.constant 0 : i32
    return %c0_i32, %c0_i32_0 : i32, i32
  }
  func.func @transform_4(%arg0: i32, %arg1: i32) -> (i32, i32) {
    %c0_i32 = arith.constant 0 : i32
    %c0_i32_0 = arith.constant 0 : i32
    %c0_i32_1 = arith.constant 0 : i32
    return %c0_i32, %c0_i32_0 : i32, i32
  }
  func.func @transform_5(%arg0: i32, %arg1: i32) -> (i32, i32) {
    %c0_i32 = arith.constant 0 : i32
    %c0_i32_0 = arith.constant 0 : i32
    %c0_i32_1 = arith.constant 0 : i32
    return %c0_i32, %c0_i32_0 : i32, i32
  }
  func.func @transform_6(%arg0: i32, %arg1: i32) -> (i32, i32) {
    %c0_i32 = arith.constant 0 : i32
    %c0_i32_0 = arith.constant 0 : i32
    %c0_i32_1 = arith.constant 0 : i32
    return %c0_i32, %c0_i32_0 : i32, i32
  }
  func.func @transform_7(%arg0: i32, %arg1: i32) -> (i32, i32, i32) {
    %c0_i32 = arith.constant 0 : i32
    %c0_i32_0 = arith.constant 0 : i32
    %c0_i32_1 = arith.constant 0 : i32
    %c0_i32_2 = arith.constant 0 : i32
    return %c0_i32, %c0_i32_0, %c0_i32_1 : i32, i32, i32
  }
  func.func @transform_8(%arg0: i32, %arg1: i32) -> (i32, i32) {
    %c0_i32 = arith.constant 0 : i32
    %c0_i32_0 = arith.constant 0 : i32
    %c0_i32_1 = arith.constant 0 : i32
    return %c0_i32, %c0_i32_0 : i32, i32
  }
  func.func @transform_9(%arg0: i32, %arg1: i32) -> (i32, i32) {
    %c1_i32 = arith.constant 1 : i32
    %0 = arith.muli %arg0, %c1_i32 : i32
    %1 = arith.addi %0, %arg1 : i32
    %c0_i32 = arith.constant 0 : i32
    %c0_i32_0 = arith.constant 0 : i32
    return %c0_i32, %1 : i32, i32
  }
  func.func @transform_10(%arg0: i32, %arg1: i32) -> (i32, i32) {
    %c1_i32 = arith.constant 1 : i32
    %0 = arith.muli %arg0, %c1_i32 : i32
    %1 = arith.addi %0, %arg1 : i32
    %c0_i32 = arith.constant 0 : i32
    %c0_i32_0 = arith.constant 0 : i32
    return %c0_i32, %1 : i32, i32
  }
  func.func @transform_11(%arg0: i32, %arg1: i32) -> (i32, i32) {
    %c1_i32 = arith.constant 1 : i32
    %0 = arith.muli %arg0, %c1_i32 : i32
    %1 = arith.addi %0, %arg1 : i32
    %c0_i32 = arith.constant 0 : i32
    %c0_i32_0 = arith.constant 0 : i32
    return %c0_i32, %1 : i32, i32
  }
  func.func @transform_12(%arg0: i32, %arg1: i32) -> (i32, i32, i32) {
    %c0_i32 = arith.constant 0 : i32
    %c0_i32_0 = arith.constant 0 : i32
    %c0_i32_1 = arith.constant 0 : i32
    return %arg0, %c0_i32, %c0_i32_0 : i32, i32, i32
  }
  func.func @transform_13(%arg0: i32, %arg1: i32) -> (i32, i32, i32) {
    %c0_i32 = arith.constant 0 : i32
    %c0_i32_0 = arith.constant 0 : i32
    %c0_i32_1 = arith.constant 0 : i32
    return %arg0, %c0_i32, %c0_i32_0 : i32, i32, i32
  }
}

</mosaic_0001>

<bundles_post_ra>
// kernel: luong_decoder_forward.1
= control target key start
LH: loop header
LB: loop body
LE: loop exit
PB: predicated region body
PF: predicated region fallthrough
CT: control target
= control target key end

     0   :  { %19 = vsyncpa [#allocation4], 0  ;;  %v2446_v7 = vmov 0.0   ;;  %vm143_vm0 = vcmask 261120   ;;  %v2448_v31 = vmov 0.0|0.0   ;;  %s2432_s0 = inlined_call_operand.vmem [shape: f32[2,32], index: 0, kind: input, shape index: {}]   ;;  %s2433_s1 = inlined_call_operand.vmem [shape: f32[2,32], index: 1, kind: input, shape index: {}]   ;;  %s2434_s2 = inlined_call_operand.vmem [shape: f32[2,128,32], index: 2, kind: input, shape index: {}]   ;;  %s2435_s3 = inlined_call_operand.vmem [shape: f32[32,384], index: 3, kind: input, shape index: {}]   ;;  %s2436_s4 = inlined_call_operand.vmem [shape: f32[32,384], index: 4, kind: input, shape index: {}]   ;;  %s2437_s5 = inlined_call_operand.vmem [shape: f32[1,384], index: 5, kind: input, shape index: {}]   ;;  %s2438_s6 = inlined_call_operand.vmem [shape: f32[1,384], index: 6, kind: input, shape index: {}]   ;;  %s2439_s7 = inlined_call_operand.vmem [shape: f32[2,32,32], index: 7, kind: input, shape index: {}]   ;;  %s2440_s8 = inlined_call_operand.vmem [shape: f32[1,32], index: 8, kind: input, shape index: {}]   ;;  %s2441_s9 = inlined_call_operand.vmem [shape: bf16[32,128], index: 9, kind: input, shape index: {}]   ;;  %s2442_s10 = inlined_call_operand.vmem [shape: f32[1,128], index: 10, kind: input, shape index: {}]   ;;  %s2443_s11 = inlined_call_operand.hbm [shape: f32[2,128], index: 11, kind: output, shape index: {0}]   ;;  %s2444_s12 = inlined_call_operand.hbm [shape: f32[1,2,32], index: 12, kind: output, shape index: {1}]   ;;  %s2445_s13 = inlined_call_operand.hbm [shape: f32[1,2,128], index: 13, kind: output, shape index: {2}]  }
   0x1   :  { %v115_v0 = vld [vmem:[%s2435_s3 + $0x8] sm:$0xff]  ;;  %v118_v1 = vld [vmem:[%s2435_s3 + $0x20] sm:$0xff]  ;;  %v117_v4 = vld [vmem:[%s2435_s3 + $0x18] sm:$0xff]  ;;  %211 = vmatprep.mubr.f32.mxu1 %v2446_v7  ;;  %384 = vmatprep.mubr.f32.mxu0 %v2446_v7 }
   0x2   :  { %v114_v2 = vld [vmem:[%s2435_s3] sm:$0xff]  ;;  %v1507_v3 = vpack.c.bf16 %v118_v1, %v115_v0  ;;  %v289_v5 = vld [vmem:[%s2436_s4 + $0x8] sm:$0xff]  ;;  %v121_v10 = vld [vmem:[%s2435_s3 + $0x38] sm:$0xff] }
   0x3   :  { %v292_v6 = vld [vmem:[%s2436_s4 + $0x20] sm:$0xff]  ;;  %v1509_v8 = vpack.c.bf16 %v117_v4, %v114_v2  ;;  %v124_v11 = vld [vmem:[%s2435_s3 + $0x50] sm:$0xff]  ;;  %v291_v14 = vld [vmem:[%s2436_s4 + $0x18] sm:$0xff] }
   0x4   :  { %v1521_v9 = vpack.c.bf16 %v292_v6, %v289_v5  ;;  %v288_v12 = vld [vmem:[%s2436_s4] sm:$0xff]  ;;  %1508 = vmatprep.subr.bf16.mxu1 %v1507_v3  ;;  %v1511_v13 = vpack.c.bf16 %v124_v11, %v121_v10  ;;  %v120_v15 = vld [vmem:[%s2435_s3 + $0x30] sm:$0xff]  ;;  %v123_v16 = vld [vmem:[%s2435_s3 + $0x48] sm:$0xff] }
   0x5   :  { %1510 = vmatpush1.bf16.msra.mxu1 %v1509_v8  ;;  %v1523_v17 = vpack.c.bf16 %v291_v14, %v288_v12  ;;  %v1513_v18 = vpack.c.bf16 %v123_v16, %v120_v15  ;;  %v295_v19 = vld [vmem:[%s2436_s4 + $0x38] sm:$0xff]  ;;  %v298_v20 = vld [vmem:[%s2436_s4 + $0x50] sm:$0xff]  ;;  %v297_v23 = vld [vmem:[%s2436_s4 + $0x48] sm:$0xff] }
   0x6   :  { %1522 = vmatprep.subr.bf16.mxu0 %v1521_v9  ;;  %1512 = vmatprep.subr.bf16.mxu1 %v1511_v13  ;;  %v1525_v21 = vpack.c.bf16 %v298_v20, %v295_v19  ;;  %v294_v22 = vld [vmem:[%s2436_s4 + $0x30] sm:$0xff]  ;;  %v119_v26 = vld [vmem:[%s2435_s3 + $0x28] sm:$0xff]  ;;  %v80_v27 = vld [vmem:[%s2432_s0] sm:$0x3] }
   0x7   :  { %1524 = vmatpush1.bf16.msra.mxu0 %v1523_v17  ;;  %v1527_v24 = vpack.c.bf16 %v297_v23, %v294_v22  ;;  %v116_v25 = vld [vmem:[%s2435_s3 + $0x10] sm:$0xff]  ;;  %v122_v29 = vld [vmem:[%s2435_s3 + $0x40] sm:$0xff]  ;;  %v125_v30 = vld [vmem:[%s2435_s3 + $0x58] sm:$0xff] }
   0x8   :  { %1526 = vmatprep.subr.bf16.mxu0 %v1525_v21  ;;  %v1516_v28 = vpack.c.bf16 %v119_v26, %v116_v25  ;;  %v1794_v32 = vld [vmem:[%s2433_s1] sm:$0x3] }
   0x9   :  { %1514 = vmatpush1.bf16.msra.mxu1 %v1513_v18 }
   0xa   :  { %1515 = vmatprep.subr.bf16.mxu1 %v2448_v31 }
   0xb   :  { %1528 = vmatpush1.bf16.msra.mxu0 %v1527_v24 }
   0xc   :  { %20 = vsyncpa [#allocation6], 0  ;;  %1415 = vmatmul.mubr.msk.f32.vlgmr.msra.gmra.mrb[0].mxu1 %vm143_vm0, %v80_v27  ;;  %1535 = vmatprep.subr.bf16.mxu0 %v2448_v31  ;;  %v1519_v33 = vpack.c.bf16 %v125_v30, %v122_v29  ;;  %vm1650_vm1 = vmmov 0   ;;  %v290_v34 = vld [vmem:[%s2436_s4 + $0x10] sm:$0xff]  ;;  %v293_v35 = vld [vmem:[%s2436_s4 + $0x28] sm:$0xff]  ;;  %v128_v46 = vlaneseq  ;;  %vm1290_vm2 = vcmask 254976  }
   0xd   :  { %1517 = vmatpush3.bf16.msra.mxu1 %v1516_v28  ;;  %1463 = vmatprep.mubr.msk.f32.mxu1 %vm1650_vm1, %v2446_v7  ;;  %v1530_v36 = vpack.c.bf16 %v293_v35, %v290_v34  ;;  %v296_v37 = vld [vmem:[%s2436_s4 + $0x40] sm:$0xff]  ;;  %v299_v38 = vld [vmem:[%s2436_s4 + $0x58] sm:$0xff]  ;;  %v1123_v41 = vld [vmem:[%s2439_s7 + $0x8] sm:$0xff]  ;;  %v1651_v21 = vmov 1966171168   ;;  %vm687_vm3 = vcmask 130112  }
   0xe   :  { %1417 = vmatmul.mubr.msk.f32.vlgmr.msra.gmra.mrb[0].mxu0 %vm143_vm0, %v1794_v32  ;;  %1518 = vmatprep.subr.bf16.mxu1 %v2448_v31  ;;  %v1533_v39 = vpack.c.bf16 %v299_v38, %v296_v37  ;;  %v1122_v40 = vld [vmem:[%s2439_s7] sm:$0xff]  ;;  %v1124_v42 = vld [vmem:[%s2439_s7 + $0x10] sm:$0xff]  ;;  %v1125_v44 = vld [vmem:[%s2439_s7 + $0x18] sm:$0xff]  ;;  %v1841_v47 = vshrl.u32 %v128_v46, 7  ;;  %v484_v22 = vunpack.c.l.s4 %v1651_v21  ;;  %vm694_vm4 = vcmask 195712  }
   0xf   :  { %1485 = vmatprep.mubr.msk.f32.mxu0 %vm1650_vm1, %v2446_v7  ;;  %v1542_v43 = vpack.c.bf16 %v1123_v41, %v1122_v40  ;;  %v1545_v45 = vpack.c.bf16 %v1125_v44, %v1124_v42  ;;  %v126_v49 = vld [vmem:[%s2437_s5] sm:$0x7]  ;;  %v1889_v42 = vld [vmem:[%s2434_s2 + $0x88] sm:$0xff]  ;;  %vm701_vm5 = vcmask 261312   ;;  %vm708_vm6 = vcmask 326912  }
  0x10   :  { %v1844_v48 = vsub.s32 0, %v1841_v47  ;;  %v1850_v50 = vsub.s32 1, %v1841_v47  ;;  %v300_v51 = vld [vmem:[%s2438_s6] sm:$0x7]  ;;  %v138_v11 = vsub.s32 2, %v1841_v47  ;;  %v485_v24 = vunpack.c.0.s8 %v484_v22 }
  0x11   :  { %1520 = vmatpush3.bf16.msra.mxu1 %v1519_v33  ;;  %vm715_vm7 = vcmask 392512   ;;  %vm722_vm8 = vcmask 458112   ;;  %vm729_vm9 = vcmask 523712   ;;  %vm736_vm10 = vcmask 589312  }
  0x12   :  { %1529 = vmatprep.subr.bf16.mxu1 %v2448_v31  ;;  %v131_v52 = vrot.slane %v126_v49, %v1844_v48  ;;  %v135_v53 = vrot.slane %v126_v49, %v1850_v50  ;;  %v305_v54 = vrot.slane %v300_v51, %v1844_v48  ;;  %v309_v56 = vrot.slane %v300_v51, %v1850_v50 }
  0x13   :  { %v313_v12 = vrot.slane %v300_v51, %v138_v11  ;;  %v139_v15 = vrot.slane %v126_v49, %v138_v11  ;;  %v488_v29 = vsub.s32 %v485_v24, %v1841_v47  ;;  %v1899_v49 = vld [vmem:[%s2434_s2 + $0x10] sm:$0xff]  ;;  %vm743_vm11 = vcmask 654912  }
  0x14   :  { %1464 = vmatmul.mubr.msk.f32.vlgmr.msra.gmra.mrb[2].mxu1 %vm143_vm0, %v80_v27  ;;  %v1963_v11 = vld [vmem:[%s2434_s2 + $0x30] sm:$0xff]  ;;  %vm750_vm12 = vcmask 720512   ;;  %vm757_vm13 = vcmask 786112   ;;  %vm764_vm14 = vcmask 851712   ;;  %vm771_vm15 = vcmask 917312  }
  0x15   :  { %1531 = vmatpush3.bf16.msra.mxu1 %v1530_v36  ;;  %1474 = vmatprep.mubr.msk.f32.mxu1 %vm1650_vm1, %v2446_v7  ;;  %v1866_v36 = vld [vmem:[%s2434_s2] sm:$0xff] }
  0x16   :  { %1532 = vmatprep.subr.bf16.mxu1 %v2448_v31 }
  0x19   :  { %1534 = vmatpush3.bf16.msra.mxu1 %v1533_v39  ;;  %v1879_v39 = vld [vmem:[%s2434_s2 + $0x8] sm:$0xff] }
  0x1a   :  { %1541 = vmatprep.subr.bf16.mxu1 %v2448_v31 }
  0x1c   :  { %1475 = vmatmul.mubr.msk.f32.vlgmr.msra.gmra.mrb[4].mxu1 %vm143_vm0, %v1794_v32 }
  0x1d   :  { %1496 = vmatprep.mubr.msk.f32.mxu1 %vm1650_vm1, %v2446_v7  ;;  %1543 = vmatpush3.bf16.msra.mxu1 %v1542_v43 }
  0x1e   :  { %1544 = vmatprep.subr.bf16.mxu1 %v2448_v31 }
  0x21   :  { %1546 = vmatpush3.bf16.msra.mxu1 %v1545_v45 }
  0xdf   :  { %v213_v55 = vpop.f32.mrb[0].mxu1 }
  0xe0   :  { %v214_v57 = vadd.f32 %v213_v55, %v131_v52  ;;  %v215_v58 = vpop.f32.mrb[1].mxu1 }
  0xe1   :  { %v216_v59 = vadd.f32 %v215_v58, %v135_v53  ;;  %v386_v60 = vpop.f32.mrb[0].mxu0  ;;  %v1907_v53 = vld [vmem:[%s2434_s2 + $0x90] sm:$0xff] }
  0xe2   :  { %v1548_v61 = vadd.f32 %v305_v54, %v214_v57  ;;  %v388_v62 = vpop.f32.mrb[1].mxu0 }
  0xe3   :  { %v1551_v63 = vadd.f32 %v309_v56, %v216_v59  ;;  %v1915_v56 = vld [vmem:[%s2434_s2 + $0x18] sm:$0xff] }
  0xe4   :  { %v1549_v0 = vadd.f32 %v1548_v61, %v386_v60  ;;  %v1923_v59 = vld [vmem:[%s2434_s2 + $0x98] sm:$0xff] }
  0xe5   :  { %v1552_v1 = vadd.f32 %v1551_v63, %v388_v62  ;;  %v1931_v62 = vld [vmem:[%s2434_s2 + $0x20] sm:$0xff] }
  0xe6   :  { %v1419_v2 = vmul.f32 -1.442695, %v1549_v0 }
  0xe7   :  { %v284_v3 = vpop.f32.mrb[2].mxu1  ;;  %v1420_v5 = vmul.f32 -1.442695, %v1552_v1  ;;  %v1939_v1 = vld [vmem:[%s2434_s2 + $0xa0] sm:$0xff] }
  0xe8   :  { %1562 = vpow2.f32 %v1419_v2  ;;  %v1465_v4 = vpop.f32.mrb[3].mxu1  ;;  %v285_v18 = vadd.f32 %v284_v3, %v139_v15  ;;  %2469 = vst [vmem:[#allocation10_spill] sm:$0xff] %v1939_v1 }
  0xe9   :  { %1564 = vpow2.f32 %v1420_v5  ;;  %v1947_v4 = vld [vmem:[%s2434_s2 + $0x28] sm:$0xff] }
  0xef   :  { %v457_v6 = vpop.f32.mrb[4].mxu1 }
  0xf0   :  { %v1476_v8 = vpop.f32.mrb[5].mxu1  ;;  %v458_v16 = vadd.f32 %v457_v6, %v313_v12 }
  0xf1   :  { %v1955_v8 = vld [vmem:[%s2434_s2 + $0xa8] sm:$0xff] }
  0xf2   :  { %v1563_v9 = vpop.eup %1562  ;;  %2470 = vst [vmem:[#allocation11_spill] sm:$0xff] %v1955_v8 }
  0xf3   :  { %v465_v10 = vadd.f32 1.0, %v1563_v9  ;;  %v1565_v13 = vpop.eup %1564 }
  0xf4   :  { %v472_v14 = vadd.f32 1.0, %v1565_v13 }
  0xf5   :  { %1566 = vrcp.f32 %v465_v10 }
  0xf6   :  { %1568 = vrcp.f32 %v472_v14  ;;  %v1971_v14 = vld [vmem:[%s2434_s2 + $0xb0] sm:$0xff] }
  0xf7   :  { %2471 = vst [vmem:[#allocation12_spill] sm:$0xff] %v1971_v14 }
  0xff   :  { %v1567_v17 = vpop.eup %1566 }
 0x100   :  { %v475_v19 = vmul.f32 %v1567_v17, %v458_v16  ;;  %v1569_v23 = vpop.eup %1568  ;;  %v1979_v17 = vld [vmem:[%s2434_s2 + $0x38] sm:$0xff] }
 0x101   :  { %v478_v25 = vsub.f32 1.0, %v1569_v23  ;;  %v480_v28 = vmul.f32 %v1569_v23, %v1794_v32  ;;  %v1874_v32 = vld [vmem:[%s2434_s2 + $0x80] sm:$0xff] }
 0x102   :  { %v476_v20 = vadd.f32 %v475_v19, %v285_v18  ;;  %v1995_v23 = vld [vmem:[%s2434_s2 + $0x40] sm:$0xff] }
 0x103   :  { %2473 = vst [vmem:[#allocation14_spill] sm:$0xff] %v1995_v23 }
 0x104   :  { %1570 = vtanh.f32 %v476_v20  ;;  %v1987_v20 = vld [vmem:[%s2434_s2 + $0xb8] sm:$0xff] }
 0x105   :  { %2472 = vst [vmem:[#allocation13_spill] sm:$0xff] %v1987_v20 }
 0x10e   :  { %v1571_v26 = vpop.eup %1570 }
 0x10f   :  { %v479_v27 = vmul.f32 %v1571_v26, %v478_v25  ;;  %v2003_v26 = vld [vmem:[%s2434_s2 + $0xc0] sm:$0xff] }
 0x110   :  { %2474 = vst [vmem:[#allocation15_spill] sm:$0xff] %v2003_v26 }
 0x111   :  { %v481_v30 = vadd.f32 %v480_v28, %v479_v27 }
 0x113   :  { %v489_v33 = vrot.slane %v481_v30, %v488_v29  ;;  %1497 = vmatmul.mubr.msk.f32.vlgmr.msra.gmra.mrb[6].mxu1 %vm143_vm0, %v481_v30  ;;  %1291 = vst.msk [vmem:[#allocation5] sm:$0x3] %vm1290_vm2, %v481_v30  ;;  %vm778_vm2 = vcmask 982912  }
 0x115   :  { %v490_v34 = vcombine.high %v489_v33, %v489_v33  ;;  %v497_v35 = vrot.slane %v489_v33, %v488_v29 }
 0x117   :  { %v504_v37 = vrot.slane %v490_v34, %v488_v29  ;;  %v1869_v38 = vrot.slane %v497_v35, %v1844_v48  ;;  %v2011_v29 = vld [vmem:[%s2434_s2 + $0x48] sm:$0xff] }
 0x118   :  { %2475 = vst [vmem:[#allocation16_spill] sm:$0xff] %v2011_v29  ;;  %v2019_v34 = vld [vmem:[%s2434_s2 + $0xc8] sm:$0xff] }
 0x119   :  { %v1882_v40 = vrot.slane %v504_v37, %v1844_v48  ;;  %v515_v41 = vmul.f32 %v1869_v38, %v1866_v36  ;;  %v516_v45 = vmul.f32 %v1869_v38, %v1879_v39  ;;  %v517_v55 = vmul.f32 %v1869_v38, %v1899_v49  ;;  %2476 = vst [vmem:[#allocation17_spill] sm:$0xff] %v2019_v34 }
 0x11a   :  { %v518_v61 = vmul.f32 %v1869_v38, %v1915_v56  ;;  %v519_v3 = vmul.f32 %v1869_v38, %v1931_v62  ;;  %v520_v10 = vmul.f32 %v1869_v38, %v1947_v4  ;;  %v521_v16 = vmul.f32 %v1869_v38, %v1963_v11 }
 0x11b   :  { %v547_v43 = vsel %vm143_vm0, %v515_v41, 0.0  ;;  %v531_v44 = vmul.f32 %v1882_v40, %v1874_v32  ;;  %v532_v52 = vmul.f32 %v1882_v40, %v1889_v42  ;;  %v550_v54 = vsel %vm143_vm0, %v516_v45, 0.0  ;;  %v2027_v41 = vld [vmem:[%s2434_s2 + $0x50] sm:$0xff] }
 0x11c   :  { %548 = vadd.xlane.f32.xlu0 %v547_v43  ;;  %v533_v58 = vmul.f32 %v1882_v40, %v1907_v53  ;;  %v553_v60 = vsel %vm143_vm0, %v517_v55, 0.0  ;;  %v534_v0 = vmul.f32 %v1882_v40, %v1923_v59  ;;  %v556_v2 = vsel %vm143_vm0, %v518_v61, 0.0  ;;  %2477 = vst [vmem:[#allocation18_spill] sm:$0xff] %v2027_v41  ;;  %v2035_v45 = vld [vmem:[%s2434_s2 + $0xd0] sm:$0xff] }
 0x11d   :  { %v595_v51 = vsel %vm143_vm0, %v531_v44, 0.0  ;;  %v598_v57 = vsel %vm143_vm0, %v532_v52, 0.0  ;;  %v535_v6 = vmul.f32 %v1882_v40, %v1939_v1  ;;  %v559_v9 = vsel %vm143_vm0, %v519_v3, 0.0  ;;  %2478 = vst [vmem:[#allocation19_spill] sm:$0xff] %v2035_v45  ;;  %v2067_v3 = vld [vmem:[%s2434_s2 + $0xe0] sm:$0xff] }
 0x11e   :  { %596 = vadd.xlane.f32.xlu1 %v595_v51  ;;  %v601_v63 = vsel %vm143_vm0, %v533_v58, 0.0  ;;  %v604_v5 = vsel %vm143_vm0, %v534_v0, 0.0  ;;  %v536_v13 = vmul.f32 %v1882_v40, %v1955_v8  ;;  %v562_v15 = vsel %vm143_vm0, %v520_v10, 0.0  ;;  %v2051_v58 = vld [vmem:[%s2434_s2 + $0xd8] sm:$0xff]  ;;  %2482 = vst [vmem:[#allocation23_spill] sm:$0xff] %v2067_v3 }
 0x11f   :  { %v607_v12 = vsel %vm143_vm0, %v535_v6, 0.0  ;;  %v537_v19 = vmul.f32 %v1882_v40, %v1971_v14  ;;  %v565_v21 = vsel %vm143_vm0, %v521_v16, 0.0  ;;  %v522_v22 = vmul.f32 %v1869_v38, %v1979_v17  ;;  %2480 = vst [vmem:[#allocation21_spill] sm:$0xff] %v2051_v58 }
 0x120   :  { %551 = vadd.xlane.f32.xlu0 %v550_v54  ;;  %v610_v18 = vsel %vm143_vm0, %v536_v13, 0.0  ;;  %v538_v25 = vmul.f32 %v1882_v40, %v1987_v20  ;;  %v523_v28 = vmul.f32 %v1869_v38, %v1995_v23  ;;  %v539_v33 = vmul.f32 %v1882_v40, %v2003_v26  ;;  %v2043_v54 = vld [vmem:[%s2434_s2 + $0x58] sm:$0xff]  ;;  %v2083_v13 = vld [vmem:[%s2434_s2 + $0xe8] sm:$0xff] }
 0x121   :  { %v613_v24 = vsel %vm143_vm0, %v537_v19, 0.0  ;;  %v568_v27 = vsel %vm143_vm0, %v522_v22, 0.0  ;;  %v524_v37 = vmul.f32 %v1869_v38, %v2011_v29  ;;  %v540_v44 = vmul.f32 %v1882_v40, %v2019_v34  ;;  %2479 = vst [vmem:[#allocation20_spill] sm:$0xff] %v2043_v54  ;;  %2484 = vst [vmem:[#allocation25_spill] sm:$0xff] %v2083_v13  ;;  %v2099_v22 = vld [vmem:[%s2434_s2 + $0xf0] sm:$0xff] }
 0x122   :  { %599 = vadd.xlane.f32.xlu1 %v598_v57  ;;  %v616_v30 = vsel %vm143_vm0, %v538_v25, 0.0  ;;  %v571_v35 = vsel %vm143_vm0, %v523_v28, 0.0  ;;  %v619_v43 = vsel %vm143_vm0, %v539_v33, 0.0  ;;  %v525_v52 = vmul.f32 %v1869_v38, %v2027_v41  ;;  %2486 = vst [vmem:[#allocation27_spill] sm:$0xff] %v2099_v22  ;;  %v2115_v33 = vld [vmem:[%s2434_s2 + $0xf8] sm:$0xff] }
 0x123   :  { %v574_v51 = vsel %vm143_vm0, %v524_v37, 0.0  ;;  %v622_v55 = vsel %vm143_vm0, %v540_v44, 0.0  ;;  %v541_v57 = vmul.f32 %v1882_v40, %v2035_v45  ;;  %v526_v61 = vmul.f32 %v1869_v38, %v2043_v54  ;;  %2488 = vst [vmem:[#allocation29_spill] sm:$0xff] %v2115_v33 }
 0x124   :  { %554 = vadd.xlane.f32.xlu0 %v553_v60  ;;  %v577_v60 = vsel %vm143_vm0, %v525_v52, 0.0  ;;  %v546_v44 = vmul.f32 %v1882_v40, %v2115_v33 }
 0x125   :  { %v625_v0 = vsel %vm143_vm0, %v541_v57, 0.0 }
 0x126   :  { %602 = vadd.xlane.f32.xlu1 %v601_v63  ;;  %v2059_v63 = vld [vmem:[%s2434_s2 + $0x60] sm:$0xff]  ;;  %v640_v52 = vsel %vm143_vm0, %v546_v44, 0.0 }
 0x127   :  { %2481 = vst [vmem:[#allocation22_spill] sm:$0xff] %v2059_v63  ;;  %v527_v6 = vmul.f32 %v1869_v38, %v2059_v63 }
 0x128   :  { %557 = vadd.xlane.f32.xlu0 %v556_v2  ;;  %v542_v2 = vmul.f32 %v1882_v40, %v2051_v58 }
 0x12a   :  { %605 = vadd.xlane.f32.xlu1 %v604_v5  ;;  %v580_v5 = vsel %vm143_vm0, %v526_v61, 0.0  ;;  %v628_v10 = vsel %vm143_vm0, %v542_v2, 0.0 }
 0x12c   :  { %560 = vadd.xlane.f32.xlu0 %v559_v9  ;;  %v2075_v9 = vld [vmem:[%s2434_s2 + $0x68] sm:$0xff] }
 0x12d   :  { %2483 = vst [vmem:[#allocation24_spill] sm:$0xff] %v2075_v9  ;;  %v528_v16 = vmul.f32 %v1869_v38, %v2075_v9 }
 0x12e   :  { %608 = vadd.xlane.f32.xlu1 %v607_v12  ;;  %v543_v12 = vmul.f32 %v1882_v40, %v2067_v3 }
 0x130   :  { %563 = vadd.xlane.f32.xlu0 %v562_v15  ;;  %v583_v15 = vsel %vm143_vm0, %v527_v6, 0.0  ;;  %v631_v19 = vsel %vm143_vm0, %v543_v12, 0.0 }
 0x132   :  { %611 = vadd.xlane.f32.xlu1 %v610_v18  ;;  %v2091_v18 = vld [vmem:[%s2434_s2 + $0x70] sm:$0xff] }
 0x133   :  { %2485 = vst [vmem:[#allocation26_spill] sm:$0xff] %v2091_v18  ;;  %v529_v25 = vmul.f32 %v1869_v38, %v2091_v18 }
 0x134   :  { %566 = vadd.xlane.f32.xlu0 %v565_v21  ;;  %v544_v21 = vmul.f32 %v1882_v40, %v2083_v13 }
 0x136   :  { %614 = vadd.xlane.f32.xlu1 %v613_v24  ;;  %v586_v24 = vsel %vm143_vm0, %v528_v16, 0.0  ;;  %v634_v28 = vsel %vm143_vm0, %v544_v21, 0.0 }
 0x138   :  { %569 = vadd.xlane.f32.xlu0 %v568_v27  ;;  %v2107_v27 = vld [vmem:[%s2434_s2 + $0x78] sm:$0xff] }
 0x139   :  { %2487 = vst [vmem:[#allocation28_spill] sm:$0xff] %v2107_v27  ;;  %v530_v37 = vmul.f32 %v1869_v38, %v2107_v27 }
 0x13a   :  { %617 = vadd.xlane.f32.xlu1 %v616_v30  ;;  %v545_v30 = vmul.f32 %v1882_v40, %v2099_v22 }
 0x13c   :  { %572 = vadd.xlane.f32.xlu0 %v571_v35  ;;  %v589_v35 = vsel %vm143_vm0, %v529_v25, 0.0  ;;  %v2160_v25 = vand.u32 127, %v128_v46 }
 0x13e   :  { %620 = vadd.xlane.f32.xlu1 %v619_v43  ;;  %v637_v43 = vsel %vm143_vm0, %v545_v30, 0.0  ;;  %v682_v30 = vadd.s32 4294967288, %v2160_v25  ;;  %v696_v44 = vadd.s32 4294967272, %v2160_v25  ;;  %v703_v46 = vadd.s32 4294967264, %v2160_v25 }
 0x13f   :  { %v710_v31 = vadd.s32 4294967256, %v2160_v25  ;;  %v717_v33 = vadd.s32 4294967248, %v2160_v25  ;;  %v724_v22 = vadd.s32 4294967240, %v2160_v25  ;;  %v731_v13 = vadd.s32 4294967232, %v2160_v25 }
 0x140   :  { %575 = vadd.xlane.f32.xlu0 %v574_v51  ;;  %v592_v51 = vsel %vm143_vm0, %v530_v37, 0.0  ;;  %v689_v37 = vadd.s32 4294967280, %v2160_v25  ;;  %v738_v3 = vadd.s32 4294967224, %v2160_v25  ;;  %v699_v18 = vsub.s32 %v696_v44, %v1841_v47 }
 0x141   :  { %v745_v58 = vadd.s32 4294967216, %v2160_v25  ;;  %v752_v45 = vadd.s32 4294967208, %v2160_v25  ;;  %v706_v9 = vsub.s32 %v703_v46, %v1841_v47  ;;  %v766_v63 = vadd.s32 4294967192, %v2160_v25 }
 0x142   :  { %623 = vadd.xlane.f32.xlu1 %v622_v55  ;;  %v692_v27 = vsub.s32 %v689_v37, %v1841_v47  ;;  %v759_v37 = vadd.s32 4294967200, %v2160_v25  ;;  %v713_v26 = vsub.s32 %v710_v31, %v1841_v47  ;;  %v720_v54 = vsub.s32 %v717_v33, %v1841_v47 }
 0x143   :  { %v727_v44 = vsub.s32 %v724_v22, %v1841_v47  ;;  %v2197_v20 = vsub.s32 %v731_v13, %v1841_v47  ;;  %v2200_v46 = vsub.s32 %v738_v3, %v1841_v47  ;;  %v773_v14 = vadd.s32 4294967184, %v2160_v25 }
 0x144   :  { %578 = vadd.xlane.f32.xlu0 %v577_v60  ;;  %v780_v29 = vadd.s32 4294967176, %v2160_v25  ;;  %v2209_v22 = vsub.s32 %v745_v58, %v1841_v47  ;;  %v2212_v13 = vsub.s32 %v752_v45, %v1841_v47  ;;  %v2217_v23 = vsub.s32 %v759_v37, %v1841_v47 }
 0x145   :  { %v2231_v37 = vsub.s32 %v773_v14, %v1841_v47 }
 0x146   :  { %626 = vadd.xlane.f32.xlu1 %v625_v0 }
 0x148   :  { %581 = vadd.xlane.f32.xlu0 %v580_v5 }
 0x14a   :  { %629 = vadd.xlane.f32.xlu1 %v628_v10 }
 0x14c   :  { %584 = vadd.xlane.f32.xlu0 %v583_v15 }
 0x14e   :  { %632 = vadd.xlane.f32.xlu1 %v631_v19 }
 0x150   :  { %587 = vadd.xlane.f32.xlu0 %v586_v24 }
 0x152   :  { %635 = vadd.xlane.f32.xlu1 %v634_v28 }
 0x154   :  { %590 = vadd.xlane.f32.xlu0 %v589_v35 }
 0x156   :  { %638 = vadd.xlane.f32.xlu1 %v637_v43 }
 0x158   :  { %593 = vadd.xlane.f32.xlu0 %v592_v51  ;;  %v680_v51 = vsub.s32 %v2160_v25, %v1841_v47 }
 0x15a   :  { %641 = vadd.xlane.f32.xlu1 %v640_v52  ;;  %v685_v52 = vsub.s32 %v682_v30, %v1841_v47 }
 0x1a9   :  { %v2125_v55 = vpop.xlane.xlu0 %548 }
 0x1ab   :  { %v2127_v57 = vpop.xlane.xlu1 %596 }
 0x1ac   :  { %v790_v58 = vrot.slane %v2127_v57, %v680_v51 }
 0x1ad   :  { %v2129_v60 = vpop.xlane.xlu0 %551 }
 0x1ae   :  { %v686_v31 = vrot.slane %v2129_v60, %v685_v52  ;;  %v2222_v60 = vsub.s32 %v766_v63, %v1841_v47  ;;  %v2234_v63 = vsub.s32 %v780_v29, %v1841_v47 }
 0x1af   :  { %v2131_v38 = vpop.xlane.xlu1 %599 }
 0x1b0   :  { %v794_v33 = vrot.slane %v2131_v38, %v685_v52  ;;  %v681_v38 = vrot.slane %v2125_v55, %v680_v51 }
 0x1b1   :  { %v2133_v61 = vpop.xlane.xlu0 %554 }
 0x1b2   :  { %v693_v3 = vrot.slane %v2133_v61, %v692_v27  ;;  %v688_v55 = vsel %vm687_vm3, %v686_v31, %v681_v38  ;;  %v795_v57 = vsel %vm687_vm3, %v794_v33, %v790_v58  ;;  %vm785_vm3 = vcmask 1048512  }
 0x1b3   :  { %v2135_v0 = vpop.xlane.xlu1 %602 }
 0x1b4   :  { %v799_v8 = vrot.slane %v2135_v0, %v692_v27 }
 0x1b5   :  { %v2137_v40 = vpop.xlane.xlu0 %557 }
 0x1b6   :  { %v700_v45 = vrot.slane %v2137_v40, %v699_v18 }
 0x1b7   :  { %v2139_v2 = vpop.xlane.xlu1 %605 }
 0x1b8   :  { %v804_v52 = vrot.slane %v2139_v2, %v699_v18  ;;  %v695_v2 = vsel %vm694_vm4, %v693_v3, %v688_v55 }
 0x1b9   :  { %v2141_v5 = vpop.xlane.xlu0 %560  ;;  %v702_v29 = vsel %vm701_vm5, %v700_v45, %v695_v2 }
 0x1ba   :  { %v707_v27 = vrot.slane %v2141_v5, %v706_v9 }
 0x1bb   :  { %v2143_v6 = vpop.xlane.xlu1 %608 }
 0x1bc   :  { %v809_v61 = vrot.slane %v2143_v6, %v706_v9  ;;  %v800_v9 = vsel %vm694_vm4, %v799_v8, %v795_v57  ;;  %vm866_vm4 = vcmask 1041409  }
 0x1bd   :  { %v2145_v10 = vpop.xlane.xlu0 %563  ;;  %v805_v6 = vsel %vm701_vm5, %v804_v52, %v800_v9  ;;  %vm645_vm5 = vcmp.lt.s32.totalorder %v2160_v25, 8 }
 0x1be   :  { %v714_v40 = vrot.slane %v2145_v10, %v713_v26 }
 0x1bf   :  { %v2147_v12 = vpop.xlane.xlu1 %611 }
 0x1c0   :  { %v814_v18 = vrot.slane %v2147_v12, %v713_v26  ;;  %v709_v26 = vsel %vm708_vm6, %v707_v27, %v702_v29  ;;  %v810_v12 = vsel %vm708_vm6, %v809_v61, %v805_v6  ;;  %vm870_vm6 = vcmask 1041408  }
 0x1c1   :  { %v2149_v15 = vpop.xlane.xlu0 %566 }
 0x1c2   :  { %v721_v5 = vrot.slane %v2149_v15, %v720_v54  ;;  %v815_v31 = vsel %vm715_vm7, %v814_v18, %v810_v12 }
 0x1c3   :  { %v2151_v16 = vpop.xlane.xlu1 %614 }
 0x1c4   :  { %v819_v14 = vrot.slane %v2151_v16, %v720_v54  ;;  %v716_v16 = vsel %vm715_vm7, %v714_v40, %v709_v26 }
 0x1c5   :  { %v2153_v19 = vpop.xlane.xlu0 %569 }
 0x1c6   :  { %v728_v51 = vrot.slane %v2153_v19, %v727_v44  ;;  %v820_v33 = vsel %vm722_vm8, %v819_v14, %v815_v31 }
 0x1c7   :  { %v2155_v21 = vpop.xlane.xlu1 %617 }
 0x1c8   :  { %v824_v10 = vrot.slane %v2155_v21, %v727_v44  ;;  %v723_v44 = vsel %vm722_vm8, %v721_v5, %v716_v16 }
 0x1c9   :  { %v2157_v24 = vpop.xlane.xlu0 %572  ;;  %v730_v3 = vsel %vm729_vm9, %v728_v51, %v723_v44 }
 0x1ca   :  { %v735_v8 = vrot.slane %v2157_v24, %v2197_v20  ;;  %v825_v38 = vsel %vm729_vm9, %v824_v10, %v820_v33  ;;  %v1423_v33 = vld [vmem:[%s2439_s7 + $0x30] sm:$0xff] }
 0x1cb   :  { %v2162_v28 = vpop.xlane.xlu1 %620 }
 0x1cc   :  { %v829_v54 = vrot.slane %v2162_v28, %v2197_v20 }
 0x1cd   :  { %v2165_v35 = vpop.xlane.xlu0 %575 }
 0x1ce   :  { %v742_v19 = vrot.slane %v2165_v35, %v2200_v46  ;;  %v830_v58 = vsel %vm736_vm10, %v829_v54, %v825_v38  ;;  %v2490_v38 = vmov 0.0  }
 0x1cf   :  { %v2168_v43 = vpop.xlane.xlu1 %623 }
 0x1d0   :  { %v834_v21 = vrot.slane %v2168_v43, %v2200_v46  ;;  %v737_v46 = vsel %vm736_vm10, %v735_v8, %v730_v3  ;;  %v2489_v3 = vmov 0.0|0.0  }
 0x1d1   :  { %v2175_v7 = vpop.xlane.xlu0 %578  ;;  %v744_v45 = vsel %vm743_vm11, %v742_v19, %v737_v46 }
 0x1d2   :  { %v749_v24 = vrot.slane %v2175_v7, %v2209_v22  ;;  %v835_v52 = vsel %vm743_vm11, %v834_v21, %v830_v58 }
 0x1d3   :  { %v2183_v30 = vpop.xlane.xlu1 %626 }
 0x1d4   :  { %v839_v20 = vrot.slane %v2183_v30, %v2209_v22 }
 0x1d5   :  { %v2189_v34 = vpop.xlane.xlu0 %581 }
 0x1d6   :  { %v756_v35 = vrot.slane %v2189_v34, %v2212_v13 }
 0x1d7   :  { %v2202_v41 = vpop.xlane.xlu1 %629 }
 0x1d8   :  { %v844_v43 = vrot.slane %v2202_v41, %v2212_v13  ;;  %v751_v41 = vsel %vm750_vm12, %v749_v24, %v744_v45  ;;  %v840_v13 = vsel %vm750_vm12, %v839_v20, %v835_v52  ;;  %v1424_v20 = vld [vmem:[%s2439_s7 + $0x38] sm:$0xff] }
 0x1d9   :  { %v2219_v1 = vpop.xlane.xlu0 %584 }
 0x1da   :  { %v763_v7 = vrot.slane %v2219_v1, %v2217_v23 }
 0x1db   :  { %v633_v0 = vpop.xlane.xlu1 %632 }
 0x1dc   :  { %v849_v30 = vrot.slane %v633_v0, %v2217_v23  ;;  %v758_v23 = vsel %vm757_vm13, %v756_v35, %v751_v41  ;;  %v845_v0 = vsel %vm757_vm13, %v844_v43, %v840_v13 }
 0x1dd   :  { %v588_v47 = vpop.xlane.xlu0 %587 }
 0x1de   :  { %v770_v27 = vrot.slane %v588_v47, %v2222_v60  ;;  %v850_v18 = vsel %vm764_vm14, %v849_v30, %v845_v0 }
 0x1df   :  { %v636_v15 = vpop.xlane.xlu1 %635 }
 0x1e0   :  { %v854_v34 = vrot.slane %v636_v15, %v2222_v60  ;;  %v765_v60 = vsel %vm764_vm14, %v763_v7, %v758_v23 }
 0x1e1   :  { %v591_v28 = vpop.xlane.xlu0 %590  ;;  %v772_v5 = vsel %vm771_vm15, %v770_v27, %v765_v60 }
 0x1e2   :  { %v777_v61 = vrot.slane %v591_v28, %v2231_v37  ;;  %v1539_v28 = vpack.c.bf16 %v1424_v20, %v1423_v33 }
 0x1e3   :  { %v639_v22 = vpop.xlane.xlu1 %638 }
 0x1e4   :  { %v859_v55 = vrot.slane %v639_v22, %v2231_v37  ;;  %v855_v37 = vsel %vm771_vm15, %v854_v34, %v850_v18  ;;  %v779_v47 = vsel %vm778_vm2, %v777_v61, %v772_v5 }
 0x1e5   :  { %v594_v1 = vpop.xlane.xlu0 %593 }
 0x1e6   :  { %v784_v57 = vrot.slane %v594_v1, %v2234_v63  ;;  %v2288_v40 = vpop.f32.mrb[6].mxu1  ;;  %v860_v29 = vsel %vm778_vm2, %v859_v55, %v855_v37 }
 0x1e7   :  { %v1498_v2 = vpop.f32.mrb[7].mxu1  ;;  %v642_v9 = vpop.xlane.xlu1 %641 }
 0x1e8   :  { %v864_v14 = vrot.slane %v642_v9, %v2234_v63  ;;  %v786_v6 = vsel %vm785_vm3, %v784_v57, %v779_v47 }
 0x1ea   :  { %v865_v51 = vsel %vm785_vm3, %v864_v14, %v860_v29 }
 0x1eb   :  { %v867_v10 = vsel %vm866_vm4, %v865_v51, %v786_v6 }
 0x1ec   :  { %v869_v26 = vsel %vm645_vm5, %v867_v10, -1e+30 }
 0x1ed   :  { %v871_v12 = vsel %vm870_vm6, %v869_v26, -inf }
 0x1ee   :  { %872 = vmax.xlane.f32.xlu0 %v871_v12 }
 0x27b   :  { %v873_v8 = vpop.xlane.xlu0 %872 }
 0x27c   :  { %v874_v54 = vsub.f32 %v869_v26, %v873_v8 }
 0x27e   :  { %v875_v15 = vmul.f32 1.442695, %v874_v54 }
 0x280   :  { %1572 = vpow2.f32 %v875_v15 }
 0x28a   :  { %v1573_v16 = vpop.eup %1572 }
 0x28b   :  { %v877_v31 = vsel %vm870_vm6, %v1573_v16, 0.0 }
 0x28c   :  { %878 = vadd.xlane.f32.xlu1 %v877_v31 }
 0x319   :  { %v879_v63 = vpop.xlane.xlu1 %878 }
 0x31a   :  { %1574 = vrcp.f32 %v879_v63  ;;  %v2492_v63 = vld [vmem:[#allocation14_spill] sm:$0xff] }
 0x324   :  { %v1575_v19 = vpop.eup %1574 }
 0x325   :  { %v881_v21 = vmul.f32 %v1575_v19, %v1573_v16  ;;  %v2491_v16 = vld [vmem:[#allocation10_spill] sm:$0xff] }
 0x327   :  { %v885_v25 = vrot.slane %v881_v21, %v1844_v48  ;;  %1292 = vst [vmem:[#allocation7] sm:$0x3] %v881_v21  ;;  %v952_v44 = vrot.slane %v881_v21, %v1850_v50  ;;  %v1421_v48 = vld [vmem:[%s2439_s7 + $0x20] sm:$0xff]  ;;  %v1422_v50 = vld [vmem:[%s2439_s7 + $0x28] sm:$0xff] }
 0x328   :  { %v1536_v24 = vpack.c.bf16 %v1422_v50, %v1421_v48  ;;  %v2493_v50 = vld [vmem:[#allocation11_spill] sm:$0xff] }
 0x329   :  { %891 = vbcast.lane.b32.xlu1 %v885_v25, 264  ;;  %887 = vbcast.lane.b32.xlu0 %v885_v25, 256 }
 0x32a   :  { %1537 = vmatpush3.bf16.msra.mxu0 %v1536_v24  ;;  %v2494_v24 = vld [vmem:[#allocation16_spill] sm:$0xff] }
 0x32b   :  { %1538 = vmatprep.subr.bf16.mxu0 %v2489_v3 }
 0x32d   :  { %954 = vbcast.lane.b32.xlu1 %v952_v44, 256  ;;  %895 = vbcast.lane.b32.xlu0 %v885_v25, 272 }
 0x32e   :  { %1540 = vmatpush3.bf16.msra.mxu0 %v1539_v28 }
 0x32f   :  { %1499 = vmatprep.subr.bf16.mxu0 %v2490_v38 }
 0x331   :  { %958 = vbcast.lane.b32.xlu1 %v952_v44, 264  ;;  %899 = vbcast.lane.b32.xlu0 %v885_v25, 280 }
 0x335   :  { %962 = vbcast.lane.b32.xlu1 %v952_v44, 272  ;;  %903 = vbcast.lane.b32.xlu0 %v885_v25, 288 }
 0x339   :  { %966 = vbcast.lane.b32.xlu1 %v952_v44, 280  ;;  %907 = vbcast.lane.b32.xlu0 %v885_v25, 296 }
 0x33d   :  { %970 = vbcast.lane.b32.xlu1 %v952_v44, 288  ;;  %911 = vbcast.lane.b32.xlu0 %v885_v25, 304 }
 0x341   :  { %974 = vbcast.lane.b32.xlu1 %v952_v44, 296  ;;  %915 = vbcast.lane.b32.xlu0 %v885_v25, 312 }
 0x345   :  { %978 = vbcast.lane.b32.xlu1 %v952_v44, 304  ;;  %919 = vbcast.lane.b32.xlu0 %v885_v25, 320 }
 0x349   :  { %982 = vbcast.lane.b32.xlu1 %v952_v44, 312  ;;  %923 = vbcast.lane.b32.xlu0 %v885_v25, 328 }
 0x34d   :  { %986 = vbcast.lane.b32.xlu1 %v952_v44, 320  ;;  %927 = vbcast.lane.b32.xlu0 %v885_v25, 336 }
 0x351   :  { %990 = vbcast.lane.b32.xlu1 %v952_v44, 328  ;;  %931 = vbcast.lane.b32.xlu0 %v885_v25, 344 }
 0x355   :  { %994 = vbcast.lane.b32.xlu1 %v952_v44, 336  ;;  %935 = vbcast.lane.b32.xlu0 %v885_v25, 352 }
 0x359   :  { %998 = vbcast.lane.b32.xlu1 %v952_v44, 344  ;;  %939 = vbcast.lane.b32.xlu0 %v885_v25, 360 }
 0x35d   :  { %1002 = vbcast.lane.b32.xlu1 %v952_v44, 352  ;;  %943 = vbcast.lane.b32.xlu0 %v885_v25, 368 }
 0x361   :  { %1006 = vbcast.lane.b32.xlu1 %v952_v44, 360  ;;  %947 = vbcast.lane.b32.xlu0 %v885_v25, 376 }
 0x365   :  { %1010 = vbcast.lane.b32.xlu1 %v952_v44, 368 }
 0x369   :  { %1014 = vbcast.lane.b32.xlu1 %v952_v44, 376 }
 0x39b   :  { %v892_v35 = vpop.permute.xlu1 %891  ;;  %v888_v43 = vpop.permute.xlu0 %887 }
 0x39c   :  { %v1017_v55 = vmul.f32 %v892_v35, %v1879_v39  ;;  %v1016_v1 = vmul.f32 %v888_v43, %v1866_v36  ;;  %v2495_v43 = vld [vmem:[#allocation12_spill] sm:$0xff] }
 0x39e   :  { %v1049_v60 = vsel %vm143_vm0, %v1017_v55, 0.0  ;;  %v1048_v18 = vsel %vm143_vm0, %v1016_v1, 0.0  ;;  %v2498_v55 = vld [vmem:[#allocation20_spill] sm:$0xff] }
 0x39f   :  { %v955_v46 = vpop.permute.xlu1 %954  ;;  %v896_v58 = vpop.permute.xlu0 %895  ;;  %v1050_v37 = vadd.f32 %v1049_v60, %v1048_v18  ;;  %v2499_v60 = vld [vmem:[#allocation15_spill] sm:$0xff] }
 0x3a0   :  { %v1018_v23 = vmul.f32 %v896_v58, %v1899_v49  ;;  %v1032_v29 = vmul.f32 %v955_v46, %v1874_v32 }
 0x3a2   :  { %v1051_v9 = vsel %vm143_vm0, %v1018_v23, 0.0  ;;  %v1085_v32 = vsel %vm143_vm0, %v1032_v29, 0.0 }
 0x3a3   :  { %v959_v7 = vpop.permute.xlu1 %958  ;;  %v900_v30 = vpop.permute.xlu0 %899  ;;  %v1052_v6 = vadd.f32 %v1051_v9, %v1050_v37  ;;  %v2500_v9 = vld [vmem:[#allocation22_spill] sm:$0xff] }
 0x3a4   :  { %v1019_v2 = vmul.f32 %v900_v30, %v1915_v56  ;;  %v1033_v39 = vmul.f32 %v959_v7, %v1889_v42  ;;  %v2496_v7 = vld [vmem:[#allocation18_spill] sm:$0xff] }
 0x3a6   :  { %v1053_v36 = vsel %vm143_vm0, %v1019_v2, 0.0  ;;  %v1086_v8 = vsel %vm143_vm0, %v1033_v39, 0.0 }
 0x3a7   :  { %v963_v22 = vpop.permute.xlu1 %962  ;;  %v904_v45 = vpop.permute.xlu0 %903  ;;  %v1054_v26 = vadd.f32 %v1053_v36, %v1052_v6  ;;  %v1087_v21 = vadd.f32 %v1086_v8, %v1085_v32 }
 0x3a8   :  { %v1020_v5 = vmul.f32 %v904_v45, %v1931_v62  ;;  %v1034_v51 = vmul.f32 %v963_v22, %v1907_v53 }
 0x3aa   :  { %v1055_v56 = vsel %vm143_vm0, %v1020_v5, 0.0  ;;  %v1088_v53 = vsel %vm143_vm0, %v1034_v51, 0.0  ;;  %v2502_v51 = vld [vmem:[#allocation24_spill] sm:$0xff] }
 0x3ab   :  { %v967_v52 = vpop.permute.xlu1 %966  ;;  %v908_v27 = vpop.permute.xlu0 %907  ;;  %v1056_v15 = vadd.f32 %v1055_v56, %v1054_v26  ;;  %v1089_v28 = vadd.f32 %v1088_v53, %v1087_v21 }
 0x3ac   :  { %v1021_v49 = vmul.f32 %v908_v27, %v1947_v4  ;;  %v1035_v42 = vmul.f32 %v967_v52, %v1923_v59 }
 0x3ae   :  { %v1057_v54 = vsel %vm143_vm0, %v1021_v49, 0.0  ;;  %v1090_v59 = vsel %vm143_vm0, %v1035_v42, 0.0  ;;  %v2501_v49 = vld [vmem:[#allocation17_spill] sm:$0xff] }
 0x3af   :  { %v971_v34 = vpop.permute.xlu1 %970  ;;  %v912_v41 = vpop.permute.xlu0 %911  ;;  %v1058_v25 = vadd.f32 %v1057_v54, %v1056_v15  ;;  %v1091_v22 = vadd.f32 %v1090_v59, %v1089_v28 }
 0x3b0   :  { %v1022_v10 = vmul.f32 %v912_v41, %v1963_v11  ;;  %v1036_v31 = vmul.f32 %v971_v34, %v2491_v16  ;;  %v2497_v41 = vld [vmem:[#allocation13_spill] sm:$0xff] }
 0x3b1   :  { %v2504_v16 = vld [vmem:[#allocation21_spill] sm:$0xff] }
 0x3b2   :  { %v1059_v11 = vsel %vm143_vm0, %v1022_v10, 0.0  ;;  %v1092_v35 = vsel %vm143_vm0, %v1036_v31, 0.0 }
 0x3b3   :  { %v975_v13 = vpop.permute.xlu1 %974  ;;  %v916_v61 = vpop.permute.xlu0 %915  ;;  %v1060_v3 = vadd.f32 %v1059_v11, %v1058_v25  ;;  %v1093_v23 = vadd.f32 %v1092_v35, %v1091_v22 }
 0x3b4   :  { %v1023_v4 = vmul.f32 %v916_v61, %v1979_v17  ;;  %v1037_v33 = vmul.f32 %v975_v13, %v2493_v50 }
 0x3b6   :  { %v1061_v17 = vsel %vm143_vm0, %v1023_v4, 0.0  ;;  %v1094_v34 = vsel %vm143_vm0, %v1037_v33, 0.0 }
 0x3b7   :  { %v979_v0 = vpop.permute.xlu1 %978  ;;  %v920_v57 = vpop.permute.xlu0 %919  ;;  %v1062_v45 = vadd.f32 %v1061_v17, %v1060_v3  ;;  %v1095_v37 = vadd.f32 %v1094_v34, %v1093_v23  ;;  %v2507_v3 = vld [vmem:[#allocation25_spill] sm:$0xff] }
 0x3b8   :  { %v1024_v19 = vmul.f32 %v920_v57, %v2492_v63  ;;  %v1038_v46 = vmul.f32 %v979_v0, %v2495_v43  ;;  %v2505_v63 = vld [vmem:[#allocation26_spill] sm:$0xff]  ;;  %v2508_v43 = vld [vmem:[#allocation28_spill] sm:$0xff] }
 0x3ba   :  { %v1063_v58 = vsel %vm143_vm0, %v1024_v19, 0.0  ;;  %v1096_v0 = vsel %vm143_vm0, %v1038_v46, 0.0 }
 0x3bb   :  { %v983_v14 = vpop.permute.xlu1 %982  ;;  %v924_v47 = vpop.permute.xlu0 %923  ;;  %v1064_v57 = vadd.f32 %v1063_v58, %v1062_v45  ;;  %v1097_v10 = vadd.f32 %v1096_v0, %v1095_v37 }
 0x3bc   :  { %v1025_v20 = vmul.f32 %v924_v47, %v2494_v24  ;;  %v1039_v13 = vmul.f32 %v983_v14, %v2497_v41  ;;  %v2509_v41 = vld [vmem:[#allocation27_spill] sm:$0xff] }
 0x3be   :  { %v1065_v61 = vsel %vm143_vm0, %v1025_v20, 0.0  ;;  %v1098_v14 = vsel %vm143_vm0, %v1039_v13, 0.0 }
 0x3bf   :  { %v987_v62 = vpop.permute.xlu1 %986  ;;  %v928_v12 = vpop.permute.xlu0 %927  ;;  %v1066_v47 = vadd.f32 %v1065_v61, %v1064_v57  ;;  %v1099_v54 = vadd.f32 %v1098_v14, %v1097_v10 }
 0x3c0   :  { %v1026_v30 = vmul.f32 %v928_v12, %v2496_v7  ;;  %v1040_v18 = vmul.f32 %v987_v62, %v2499_v60  ;;  %v2503_v12 = vld [vmem:[#allocation19_spill] sm:$0xff]  ;;  %v2510_v60 = vld [vmem:[#allocation29_spill] sm:$0xff] }
 0x3c2   :  { %v1067_v2 = vsel %vm143_vm0, %v1026_v30, 0.0  ;;  %v1100_v62 = vsel %vm143_vm0, %v1040_v18, 0.0 }
 0x3c3   :  { %v991_v44 = vpop.permute.xlu1 %990  ;;  %v932_v48 = vpop.permute.xlu0 %931  ;;  %v1068_v26 = vadd.f32 %v1067_v2, %v1066_v47  ;;  %v1101_v21 = vadd.f32 %v1100_v62, %v1099_v54  ;;  %v1561_v62 = vld [vmem:[%s2441_s9 + $0x8] sm:$0xff]  }
 0x3c4   :  { %v1027_v1 = vmul.f32 %v932_v48, %v2498_v55  ;;  %v1041_v29 = vmul.f32 %v991_v44, %v2501_v49  ;;  %v2506_v48 = vld [vmem:[#allocation23_spill] sm:$0xff] }
 0x3c6   :  { %v1069_v6 = vsel %vm143_vm0, %v1027_v1, 0.0  ;;  %v1102_v53 = vsel %vm143_vm0, %v1041_v29, 0.0 }
 0x3c7   :  { %v995_v52 = vpop.permute.xlu1 %994  ;;  %v936_v27 = vpop.permute.xlu0 %935  ;;  %v1070_v4 = vadd.f32 %v1069_v6, %v1068_v26  ;;  %v1103_v33 = vadd.f32 %v1102_v53, %v1101_v21  ;;  %v1560_v26 = vld [vmem:[%s2441_s9] sm:$0xff]   ;;  %s1652_s9 = smov [#allocation5]  }
 0x3c8   :  { %v1028_v5 = vmul.f32 %v936_v27, %v2500_v9  ;;  %v1042_v8 = vmul.f32 %v995_v52, %v2503_v12  ;;  %s1381_s19 = sshll.u32 %s1652_s9, 4  ;;  %s1382_s19 = int_to_ptr.vmem [resolvable:$true] %s1381_s19 }
 0x3c9   :  { %s1578_s20 = scalar_lea.vmem %s1382_s19, 32  ;;  %p1583_p1 = scmp.lt.s32.totalorder %s1382_s19, %s1382_s19 }
 0x3ca   :  { %v1071_v42 = vsel %vm143_vm0, %v1028_v5, 0.0  ;;  %v1104_v44 = vsel %vm143_vm0, %v1042_v8, 0.0  ;;  %v1427_v8 = vld [vmem:[%s2440_s8] ss:$0 sm:$0xff]  ;;  %p1579_p0 = scmp.ne.s32.totalorder %s1382_s19, %s1578_s20  ;;  %p1584_p2 = scmp.lt.s32.totalorder %s1578_s20, %s1578_s20 }
 0x3cb   :  { %v999_v39 = vpop.permute.xlu1 %998  ;;  %v940_v36 = vpop.permute.xlu0 %939  ;;  %v1072_v25 = vadd.f32 %v1071_v42, %v1070_v4  ;;  %v1105_v58 = vadd.f32 %v1104_v44, %v1103_v33 }
 0x3cc   :  { %v1029_v56 = vmul.f32 %v940_v36, %v2502_v51  ;;  %v1043_v31 = vmul.f32 %v999_v39, %v2504_v16  ;;  %p1585_p3 = por %p1584_p2, %p1583_p1 }
 0x3ce   :  { %v1073_v11 = vsel %vm143_vm0, %v1029_v56, 0.0  ;;  %v1106_v28 = vsel %vm143_vm0, %v1043_v31, 0.0  ;;  %p1586_p4 = pnand %p1585_p3, %p1579_p0 }
 0x3cf   :  { %v1003_v32 = vpop.permute.xlu1 %1002  ;;  %v944_v15 = vpop.permute.xlu0 %943  ;;  %v1074_v17 = vadd.f32 %v1073_v11, %v1072_v25  ;;  %v1107_v45 = vadd.f32 %v1106_v28, %v1105_v58 }
 0x3d0   :  { %v1030_v19 = vmul.f32 %v944_v15, %v2505_v63  ;;  %v1044_v59 = vmul.f32 %v1003_v32, %v2506_v48 }
 0x3d2   :  { %v1075_v50 = vsel %vm143_vm0, %v1030_v19, 0.0  ;;  %v1108_v30 = vsel %vm143_vm0, %v1044_v59, 0.0 }
 0x3d3   :  { %v1007_v24 = vpop.permute.xlu1 %1006  ;;  %v948_v20 = vpop.permute.xlu0 %947  ;;  %v1076_v7 = vadd.f32 %v1075_v50, %v1074_v17  ;;  %v1109_v61 = vadd.f32 %v1108_v30, %v1107_v45 }
 0x3d4   :  { %v1045_v35 = vmul.f32 %v1007_v24, %v2507_v3  ;;  %v1031_v46 = vmul.f32 %v948_v20, %v2508_v43 }
 0x3d6   :  { %v1077_v22 = vsel %vm143_vm0, %v1031_v46, 0.0  ;;  %v1110_v34 = vsel %vm143_vm0, %v1045_v35, 0.0 }
 0x3d7   :  { %v1078_v52 = vadd.f32 %v1077_v22, %v1076_v7  ;;  %v1011_v27 = vpop.permute.xlu1 %1010  ;;  %v1111_v23 = vadd.f32 %v1110_v34, %v1109_v61 }
 0x3d8   :  { %v1046_v13 = vmul.f32 %v1011_v27, %v2509_v41 }
 0x3d9   :  { %v1079_v55 = vrot.slane %v1078_v52, 4 }
 0x3da   :  { %v1112_v1 = vsel %vm143_vm0, %v1046_v13, 0.0 }
 0x3db   :  { %v1080_v57 = vadd.f32 %v1079_v55, %v1078_v52  ;;  %v1015_v0 = vpop.permute.xlu1 %1014  ;;  %v1113_v2 = vadd.f32 %v1112_v1, %v1111_v23 }
 0x3dc   :  { %v1047_v18 = vmul.f32 %v1015_v0, %v2510_v60 }
 0x3dd   :  { %v1081_v5 = vrot.slane %v1080_v57, 2 }
 0x3de   :  { %v1114_v9 = vsel %vm143_vm0, %v1047_v18, 0.0 }
 0x3df   :  { %v1115_v37 = vadd.f32 %v1114_v9, %v1113_v2  ;;  %v1082_v39 = vadd.f32 %v1081_v5, %v1080_v57 }
 0x3e1   :  { %v1116_v47 = vrot.slane %v1115_v37, 4  ;;  %v1083_v49 = vrot.slane %v1082_v39, 1 }
 0x3e3   :  { %v1117_v36 = vadd.f32 %v1116_v47, %v1115_v37  ;;  %v1084_v51 = vadd.f32 %v1083_v49, %v1082_v39 }
 0x3e5   :  { %v1118_v14 = vrot.slane %v1117_v36, 2 }
 0x3e7   :  { %v1119_v29 = vadd.f32 %v1118_v14, %v1117_v36 }
 0x3e9   :  { %v1120_v6 = vrot.slane %v1119_v29, 1 }
 0x3eb   :  { %v1121_v56 = vadd.f32 %v1120_v6, %v1119_v29 }
 0x3ed   :  { %v1133_v10 = vsel %vm866_vm4, %v1121_v56, %v1084_v51 }
 0x3ee   :  { %1486 = vmatmul.mubr.msk.f32.vlgmr.msra.gmra.mrb[2].mxu0 %vm143_vm0, %v1133_v10 }
 0x3ef   :  { %1503 = vmatprep.mubr.msk.bf16.mxu0 %vm1650_vm1, %v2490_v38  ;;  %1500 = vmatpush3.bf16.msra.mxu0 %v1560_v26  ;;  %vm1288_vm1 = vcmask 253952  }
 0x3f0   :  { %1501 = vmatprep.subr.bf16.mxu0 %v2490_v38 }
 0x3f3   :  { %1502 = vmatpush3.bf16.msra.mxu0 %v1561_v62 }
 0x4c1   :  { %v1202_v12 = vpop.f32.mrb[2].mxu0 }
 0x4c2   :  { %v1275_v42 = vadd.f32 %v2288_v40, %v1202_v12  ;;  %v1487_v54 = vpop.f32.mrb[3].mxu0 }
 0x4c4   :  { %v1285_v4 = vadd.f32 %v1427_v8, %v1275_v42 }
 0x4c6   :  { %1576 = vtanh.f32 %v1285_v4 }
 0x4d0   :  { %v1577_v32 = vpop.eup %1576 }
 0x4d1   :  { %v1287_v15 = vpack.c.bf16 %v1577_v32, %v1577_v32 }
 0x4d3   :  { %1289 = vst.msk [vmem:[#allocation2] sm:$0x1] %vm1288_vm1, %v1287_v15 }
 0x4da   :  { %v1293_v53 = vld [vmem:[#allocation2] sm:$0x1] }
 0x4db   :  { %1504 = vmatmul.mubr.msk.bf16.vlgmr.msra.gmra.mrb[4].mxu0 %vm143_vm0, %v1293_v53 }
 0x4dc   :  { %1589 = shalt.err (!%p1586_p4)
}
 0x4dd   :  { %s1590_s22 = scalar_lea.hbm %s2444_s12, 32 }
 0x4de   :  { %p1591_p5 = scmp.ne.s32.totalorder %s2444_s12, %s1590_s22  ;;  %p1594_p6 = scmp.lt.u32.totalorder %s1590_s22, %s2444_s12 }
 0x4e0   :  { %p1596_p7 = pnand %p1594_p6, %p1591_p5 }
 0x4e2   :  { %1599 = shalt.err (!%p1596_p7)
}
 0x4e3   :  { %1384 = dma.vmem_to_hbm [thread:$0]  %s1382_s19, 32, %s2444_s12, [#allocation6]  }
 0x4e4   :  { %s1653_s28 = smov [#allocation7]  }
 0x4e5   :  { %s1391_s2 = sshll.u32 %s1653_s28, 4  ;;  %s1392_s2 = int_to_ptr.vmem [resolvable:$true] %s1391_s2 }
 0x4e6   :  { %s1600_s29 = scalar_lea.vmem %s1392_s2, 32  ;;  %p1605_p9 = scmp.lt.s32.totalorder %s1392_s2, %s1392_s2 }
 0x4e7   :  { %p1601_p8 = scmp.ne.s32.totalorder %s1392_s2, %s1600_s29  ;;  %p1606_p10 = scmp.lt.s32.totalorder %s1600_s29, %s1600_s29 }
 0x4e9   :  { %p1607_p11 = por %p1606_p10, %p1605_p9 }
 0x4eb   :  { %p1608_p12 = pnand %p1607_p11, %p1601_p8 }
 0x4ed   :  { %1611 = shalt.err (!%p1608_p12)
}
 0x4ee   :  { %s1612_s15 = scalar_lea.hbm %s2445_s13, 32 }
 0x4ef   :  { %p1613_p13 = scmp.ne.s32.totalorder %s2445_s13, %s1612_s15  ;;  %p1616_p0 = scmp.lt.u32.totalorder %s1612_s15, %s2445_s13 }
 0x4f1   :  { %p1618_p1 = pnand %p1616_p0, %p1613_p13 }
 0x4f3   :  { %1621 = shalt.err (!%p1618_p1)
}
 0x4f4   :  { %1394 = dma.vmem_to_hbm [thread:$0]  %s1392_s2, 32, %s2445_s13, [#allocation6]   ;;  %v1428_v40 = vld [vmem:[%s2442_s10] ss:$0 sm:$0xff] }
 0x4f5   :  { %s1654_s1 = smov [#allocation3]  }
 0x4f6   :  { %s1371_s18 = sshll.u32 %s1654_s1, 4  ;;  %s1372_s18 = int_to_ptr.vmem [resolvable:$true] %s1371_s18 }
 0x4f7   :  { %s1622_s9 = scalar_lea.vmem %s1372_s18, 32  ;;  %p1627_p3 = scmp.lt.s32.totalorder %s1372_s18, %s1372_s18 }
 0x4f8   :  { %p1623_p2 = scmp.ne.s32.totalorder %s1372_s18, %s1622_s9  ;;  %p1628_p4 = scmp.lt.s32.totalorder %s1622_s9, %s1622_s9 }
 0x4fa   :  { %p1629_p5 = por %p1628_p4, %p1627_p3 }
 0x4fc   :  { %p1630_p6 = pnand %p1629_p5, %p1623_p2 }
 0x5ae   :  { %v1355_v38 = vpop.f32.mrb[4].mxu0 }
 0x5af   :  { %v1356_v16 = vadd.f32 %v1428_v40, %v1355_v38  ;;  %v1505_v31 = vpop.f32.mrb[5].mxu0 }
 0x5b0   :  { %v1358_v11 = vpop.f32.mrb[6].mxu0 }
 0x5b1   :  { %1361 = vst [vmem:[#allocation3] sm:$0x3] %v1356_v16  ;;  %v1506_v63 = vpop.f32.mrb[7].mxu0 }
 0x5b2   :  { %1633 = shalt.err (!%p1630_p6)
}
 0x5b3   :  { %s1634_s10 = scalar_lea.hbm %s2443_s11, 32 }
 0x5b4   :  { %p1635_p7 = scmp.ne.s32.totalorder %s2443_s11, %s1634_s10  ;;  %p1638_p8 = scmp.lt.u32.totalorder %s1634_s10, %s2443_s11 }
 0x5b6   :  { %p1640_p9 = pnand %p1638_p8, %p1635_p7 }
 0x5b8   :  { %1643 = shalt.err (!%p1640_p9)
}
 0x5b9   :  { %1374 = dma.vmem_to_hbm [thread:$0]  %s1372_s18, 32, %s2443_s11, [#allocation4]  }
 0x5ba   :  { %1644 = dma.done.wait [#allocation4], 32  }
 0x5bb   :  { %1645 = vsyncadd [#allocation4], 4294967264 }
 0x5bc   :  { %1646 = dma.done.wait [#allocation6], 64  }
 0x5bd   :  { %1647 = vsyncadd [#allocation6], 4294967232 }
 0x5be   :  { %1404 = vsyncpa [#allocation4], 1 }
 0x5bf   :  { %1405 = vsyncpa [#allocation6], 1 }

</bundles_post_ra>
